<compile_context>
chip_gen: v7x
topology: tpu7x:2x2x1
jax: 0.10.0
libtpu: 0.0.40
codegen_flags: <defaults>
</compile_context>

<pallas_src>
import math
import jax
import jax.numpy as jnp
from jax import lax
from jax.experimental import pallas as pl
from jax.experimental.pallas import tpu as pltpu


def _round_up(x, m):
    return (x + m - 1) // m * m


def gru_recurrence_kernel(gi_ref, w_hh_ref, b_hh_n_ref, h_out_ref, h_scratch):
    """One time-chunk of the GRU recurrence for one batch shard.

    gi_ref:    (Tc, Bs, 3*Hp)  precomputed input gates (r,z biases already folded in),
                               gate g occupies lanes [g*Hp, g*Hp+H)
    w_hh_ref:  (Hp, 3*Hp)      hidden-to-hidden weights (pre-transposed, gate-aligned)
    b_hh_n_ref:(1, Hp)         n-gate hidden bias (must stay inside r * (.))
    h_out_ref: (Tc, Bs, Hp)    per-step hidden states (output)
    h_scratch: (Bs, Hp)        recurrent carry, persists across time chunks
    """
    Hp = h_scratch.shape[-1]
    Tc = gi_ref.shape[0]

    @pl.when(pl.program_id(1) == 0)          # first time-chunk of this batch shard
    def _():
        h_scratch[...] = jnp.zeros_like(h_scratch)

    w_hh = w_hh_ref[...]                      # hoisted: loaded once per chunk
    b_hh_n = b_hh_n_ref[...]

    def step(i, h_prev):
        gi_t = gi_ref[i]                      # (Bs, 3*Hp)
        gh = jnp.dot(h_prev, w_hh, preferred_element_type=jnp.float32)  # (Bs, 3*Hp)
        r = jax.nn.sigmoid(gi_t[:, 0:Hp] + gh[:, 0:Hp])
        z = jax.nn.sigmoid(gi_t[:, Hp:2 * Hp] + gh[:, Hp:2 * Hp])
        n = jnp.tanh(gi_t[:, 2 * Hp:3 * Hp] + r * (gh[:, 2 * Hp:3 * Hp] + b_hh_n))
        h_new = (1.0 - z) * n + z * h_prev
        h_out_ref[i] = h_new
        return h_new

    h_last = lax.fori_loop(0, Tc, step, h_scratch[...], unroll=(Tc <= 16))
    h_scratch[...] = h_last


def gru_module_forward(x, params, *, time_chunk=64):
    """x: (B, T, D) batch-first, like the PyTorch module. Returns (B, T, D) float32."""
    B, T, D = x.shape
    H = params["w_hh"].shape[0] // 3
    f32 = jnp.float32
    x = x.astype(f32)

    # ---------- hoisted input projection (parallel over B*T rows, plain XLA) ----------
    # gi = x @ W_ih^T + b_ih, with the r/z parts of b_hh folded in.
    b_fold = params["b_ih"] + jnp.concatenate(
        [params["b_hh"][:2 * H], jnp.zeros((H,), f32)])
    gi = jnp.einsum("btd,gd->btg", x, params["w_ih"]) + b_fold        # (B, T, 3H)

    # ---------- pad to a lane-aligned, gate-aligned, time-major layout ----------
    H_pad = _round_up(H, 128)                 # each gate starts on a 128-lane boundary
    B_pad = _round_up(B, 8)                   # sublane-aligned matmul M
    num_b_shards = 2 if (B_pad % 16 == 0) else 1   # v7x: shard batch across 2 TCs
    B_shard = B_pad // num_b_shards
    Tc = min(time_chunk, T)
    T_pad = _round_up(T, Tc)
    num_chunks = T_pad // Tc

    gi_tm = jnp.transpose(gi.reshape(B, T, 3, H), (1, 0, 2, 3))       # (T, B, 3, H)
    gi_tm = jnp.pad(gi_tm, ((0, T_pad - T), (0, B_pad - B),
                            (0, 0), (0, H_pad - H)))
    gi_tm = gi_tm.reshape(T_pad, B_pad, 3 * H_pad)                    # (T_pad, B_pad, 3Hp)

    # W_hh (3H, H) -> (Hp, 3Hp) with gate-aligned columns; padded rows/cols are zero,
    # so the padded hidden lanes stay exactly zero through the recurrence.
    w_hh_g = jnp.transpose(params["w_hh"].reshape(3, H, H), (2, 0, 1))  # (in, gate, out)
    w_hh_g = jnp.pad(w_hh_g, ((0, H_pad - H), (0, 0), (0, H_pad - H)))
    w_hh_t = w_hh_g.reshape(H_pad, 3 * H_pad)

    b_hh_n = jnp.pad(params["b_hh"][2 * H:], (0, H_pad - H)).reshape(1, H_pad)

    # ---------- explicit VMEM budget ----------
    itemsize = 4
    vmem_bytes = itemsize * (
        2 * Tc * B_shard * 3 * H_pad      # gi chunk, double-buffered
        + 2 * Tc * B_shard * H_pad        # h_out chunk, double-buffered
        + H_pad * 3 * H_pad + H_pad       # resident weights/bias (single copy)
        + B_shard * H_pad)                # h carry scratch
    vmem_limit = int(min(64 * 1024 * 1024, max(2 * vmem_bytes, 16 * 1024 * 1024)))

    grid_spec = pltpu.PrefetchScalarGridSpec(
        num_scalar_prefetch=0,
        grid=(num_b_shards, num_chunks),
        in_specs=[
            pl.BlockSpec((Tc, B_shard, 3 * H_pad), lambda s, c: (c, s, 0)),
            # invariant weights: whole-array VMEM residency, outside the pipeline
            pl.BlockSpec(memory_space=pltpu.MemorySpace.VMEM),
            pl.BlockSpec(memory_space=pltpu.MemorySpace.VMEM),
        ],
        out_specs=pl.BlockSpec((Tc, B_shard, H_pad), lambda s, c: (c, s, 0)),
        scratch_shapes=[pltpu.VMEM((B_shard, H_pad), jnp.float32)],
    )

    h_tm = pl.pallas_call(
        gru_recurrence_kernel,
        out_shape=jax.ShapeDtypeStruct((T_pad, B_pad, H_pad), jnp.float32),
        grid_spec=grid_spec,
        compiler_params=pltpu.CompilerParams(
            dimension_semantics=("parallel", "arbitrary"),
            vmem_limit_bytes=vmem_limit),
    )(gi_tm, w_hh_t, b_hh_n)

    # ---------- hoisted output projection (parallel over B*T rows, plain XLA) ----------
    gru_out = jnp.transpose(h_tm[:T, :B, :H], (1, 0, 2))              # (B, T, H)
    return gru_out @ params["w_fc"].T + params["b_fc"]                # (B, T, D)


def init_params(key, input_dim, hidden_dim):
    """Deterministic init matching PyTorch shapes (uniform(-1/sqrt(H), 1/sqrt(H)))."""
    k = 1.0 / math.sqrt(hidden_dim)
    ks = jax.random.split(key, 6)
    u = lambda kk, shape: jax.random.uniform(kk, shape, jnp.float32, -k, k)
    return {
        "w_ih": u(ks[0], (3 * hidden_dim, input_dim)),   # weight_ih_l0
        "w_hh": u(ks[1], (3 * hidden_dim, hidden_dim)),  # weight_hh_l0
        "b_ih": u(ks[2], (3 * hidden_dim,)),             # bias_ih_l0
        "b_hh": u(ks[3], (3 * hidden_dim,)),             # bias_hh_l0
        "w_fc": u(ks[4], (input_dim, hidden_dim)),       # fc.weight
        "b_fc": u(ks[5], (input_dim,)),                  # fc.bias
    }


def reference_forward(x, params):
    """Pure-JAX reference of torch GRU(batch_first) + Linear, for verification."""
    B, T, D = x.shape
    H = params["w_hh"].shape[0] // 3
    w_ih, w_hh = params["w_ih"], params["w_hh"]
    b_ih, b_hh = params["b_ih"], params["b_hh"]

    def step(h, x_t):
        gi = x_t @ w_ih.T + b_ih
        gh = h @ w_hh.T + b_hh
        r = jax.nn.sigmoid(gi[:, :H] + gh[:, :H])
        z = jax.nn.sigmoid(gi[:, H:2 * H] + gh[:, H:2 * H])
        n = jnp.tanh(gi[:, 2 * H:] + r * gh[:, 2 * H:])
        h_new = (1.0 - z) * n + z * h
        return h_new, h_new

    h0 = jnp.zeros((B, H), jnp.float32)
    _, hs = lax.scan(step, h0, jnp.transpose(x, (1, 0, 2)))   # (T, B, H)
    gru_out = jnp.transpose(hs, (1, 0, 2))                     # (B, T, H)
    return gru_out @ params["w_fc"].T + params["b_fc"]


if __name__ == "__main__":
    B, T = 2, 8
    input_dim, hidden_dim = 16, 32

    key = jax.random.PRNGKey(0)
    kx, kp = jax.random.split(key)
    x = jax.random.normal(kx, (B, T, input_dim), jnp.float32)
    params = init_params(kp, input_dim, hidden_dim)

    out = gru_module_forward(x, params)
    out = jax.block_until_ready(out)

    ref = reference_forward(x, params)
    assert out.shape == (B, T, input_dim)
    err = float(jnp.max(jnp.abs(out - ref)))
    assert jnp.allclose(out, ref, atol=1e-4, rtol=1e-4), err

    print("KERNEL_OK")
</pallas_src>

<mosaic_0001>
module attributes {stable_mosaic.version = 11 : i64} {
  func.func @gru_recurrence_kernel(%arg0: i32, %arg1: i32, %arg2: memref<8x8x384xf32, #tpu.memory_space<vmem>>, %arg3: memref<128x384xf32, #tpu.memory_space<vmem>>, %arg4: memref<1x128xf32, #tpu.memory_space<vmem>>, %arg5: memref<8x8x128xf32, #tpu.memory_space<vmem>>, %arg6: memref<8x128xf32, #tpu.memory_space<vmem>>) attributes {dimension_semantics = [#tpu.dimension_semantics<parallel>, #tpu.dimension_semantics<arbitrary>], iteration_bounds = array<i64: 1, 1>, scalar_prefetch = 0 : i64, scratch_operands = 1 : i64, tpu.core_type = #tpu.core_type<tc>, window_params = [{transform_indices = @transform_0, window_bounds = array<i64: 8, 8, 384>}, {pipeline_mode = #tpu.pipeline_mode<synchronous>, transform_indices = @transform_1, window_bounds = array<i64: 128, 384>}, {pipeline_mode = #tpu.pipeline_mode<synchronous>, transform_indices = @transform_2, window_bounds = array<i64: 1, 128>}, {transform_indices = @transform_3, window_bounds = array<i64: 8, 8, 128>}]} {
    %c0_i32 = arith.constant 0 : i32
    %0 = arith.cmpi eq, %arg1, %c0_i32 : i32
    %1 = arith.extui %0 : i1 to i32
    %c0_i32_0 = arith.constant 0 : i32
    %2 = arith.cmpi ne, %1, %c0_i32_0 : i32
    scf.if %2 {
      %cst_72 = arith.constant 0.000000e+00 : f32
      %295 = vector.broadcast %cst_72 : f32 to vector<8x128xf32>
      %c0_73 = arith.constant 0 : index
      %c0_74 = arith.constant 0 : index
      %296 = vector.load %arg6[%c0_73, %c0_74] : memref<8x128xf32, #tpu.memory_space<vmem>>, vector<8x128xf32>
      tpu.vector_store %arg6[%c0_73, %c0_74], %295 {strides = array<i32>} : memref<8x128xf32, #tpu.memory_space<vmem>>, vector<8x128xf32>,
    } else {
    }
    %c0 = arith.constant 0 : index
    %c0_1 = arith.constant 0 : index
    %3 = vector.load %arg3[%c0, %c0_1] : memref<128x384xf32, #tpu.memory_space<vmem>>, vector<128x384xf32>
    %c0_2 = arith.constant 0 : index
    %c0_3 = arith.constant 0 : index
    %4 = vector.load %arg4[%c0_2, %c0_3] : memref<1x128xf32, #tpu.memory_space<vmem>>, vector<1x128xf32>
    %c0_4 = arith.constant 0 : index
    %c0_5 = arith.constant 0 : index
    %5 = vector.load %arg6[%c0_4, %c0_5] : memref<8x128xf32, #tpu.memory_space<vmem>>, vector<8x128xf32>
    %c0_i32_6 = arith.constant 0 : i32
    %6 = arith.index_cast %c0_i32_6 : i32 to index
    %c0_7 = arith.constant 0 : index
    %c0_8 = arith.constant 0 : index
    %7 = vector.load %arg2[%6, %c0_7, %c0_8] : memref<8x8x384xf32, #tpu.memory_space<vmem>>, vector<1x8x384xf32>
    %8 = vector.shape_cast %7 : vector<1x8x384xf32> to vector<8x384xf32>
    %cst = arith.constant dense<0.000000e+00> : vector<8x384xf32>
    %9 = tpu.matmul %5, %3, %cst {dimension_numbers = #tpu.dot_dimension_numbers<[1], [0], [0], [1], [0, 0, 1, 1], [], []>} : vector<8x128xf32>, vector<128x384xf32>, vector<8x384xf32> -> vector<8x384xf32>
    %10 = vector.extract_strided_slice %8 {offsets = [0, 0], sizes = [8, 128], strides = [1, 1]} : vector<8x384xf32> to vector<8x128xf32>
    %11 = vector.extract_strided_slice %9 {offsets = [0, 0], sizes = [8, 128], strides = [1, 1]} : vector<8x384xf32> to vector<8x128xf32>
    %12 = arith.addf %10, %11 : vector<8x128xf32>
    %13 = arith.negf %12 : vector<8x128xf32>
    %14 = math.exp %13 : vector<8x128xf32>
    %cst_9 = arith.constant 1.000000e+00 : f32
    %15 = vector.broadcast %cst_9 : f32 to vector<8x128xf32>
    %16 = arith.addf %15, %14 : vector<8x128xf32>
    %17 = arith.divf %15, %16 : vector<8x128xf32>
    %18 = vector.extract_strided_slice %8 {offsets = [0, 128], sizes = [8, 128], strides = [1, 1]} : vector<8x384xf32> to vector<8x128xf32>
    %19 = vector.extract_strided_slice %9 {offsets = [0, 128], sizes = [8, 128], strides = [1, 1]} : vector<8x384xf32> to vector<8x128xf32>
    %20 = arith.addf %18, %19 : vector<8x128xf32>
    %21 = arith.negf %20 : vector<8x128xf32>
    %22 = math.exp %21 : vector<8x128xf32>
    %cst_10 = arith.constant 1.000000e+00 : f32
    %23 = vector.broadcast %cst_10 : f32 to vector<8x128xf32>
    %24 = arith.addf %23, %22 : vector<8x128xf32>
    %25 = arith.divf %23, %24 : vector<8x128xf32>
    %26 = vector.extract_strided_slice %8 {offsets = [0, 256], sizes = [8, 128], strides = [1, 1]} : vector<8x384xf32> to vector<8x128xf32>
    %27 = vector.extract_strided_slice %9 {offsets = [0, 256], sizes = [8, 128], strides = [1, 1]} : vector<8x384xf32> to vector<8x128xf32>
    %28 = vector.broadcast %4 : vector<1x128xf32> to vector<8x128xf32>
    %29 = arith.addf %27, %28 : vector<8x128xf32>
    %30 = arith.mulf %17, %29 : vector<8x128xf32>
    %31 = arith.addf %26, %30 : vector<8x128xf32>
    %32 = math.tanh %31 : vector<8x128xf32>
    %cst_11 = arith.constant 1.000000e+00 : f32
    %33 = vector.broadcast %cst_11 : f32 to vector<8x128xf32>
    %34 = arith.subf %33, %25 : vector<8x128xf32>
    %35 = arith.mulf %34, %32 : vector<8x128xf32>
    %36 = arith.mulf %25, %5 : vector<8x128xf32>
    %37 = arith.addf %35, %36 : vector<8x128xf32>
    %38 = arith.index_cast %c0_i32_6 : i32 to index
    %c0_12 = arith.constant 0 : index
    %c0_13 = arith.constant 0 : index
    %39 = vector.load %arg5[%38, %c0_12, %c0_13] : memref<8x8x128xf32, #tpu.memory_space<vmem>>, vector<1x8x128xf32>
    %40 = vector.shape_cast %39 : vector<1x8x128xf32> to vector<8x128xf32>
    %41 = vector.shape_cast %37 : vector<8x128xf32> to vector<1x8x128xf32>
    tpu.vector_store %arg5[%38, %c0_12, %c0_13], %41 {strides = array<i32>} : memref<8x8x128xf32, #tpu.memory_space<vmem>>, vector<1x8x128xf32>,
    %c1_i32 = arith.constant 1 : i32
    %42 = arith.index_cast %c1_i32 : i32 to index
    %c0_14 = arith.constant 0 : index
    %c0_15 = arith.constant 0 : index
    %43 = vector.load %arg2[%42, %c0_14, %c0_15] : memref<8x8x384xf32, #tpu.memory_space<vmem>>, vector<1x8x384xf32>
    %44 = vector.shape_cast %43 : vector<1x8x384xf32> to vector<8x384xf32>
    %cst_16 = arith.constant dense<0.000000e+00> : vector<8x384xf32>
    %45 = tpu.matmul %37, %3, %cst_16 {dimension_numbers = #tpu.dot_dimension_numbers<[1], [0], [0], [1], [0, 0, 1, 1], [], []>} : vector<8x128xf32>, vector<128x384xf32>, vector<8x384xf32> -> vector<8x384xf32>
    %46 = vector.extract_strided_slice %44 {offsets = [0, 0], sizes = [8, 128], strides = [1, 1]} : vector<8x384xf32> to vector<8x128xf32>
    %47 = vector.extract_strided_slice %45 {offsets = [0, 0], sizes = [8, 128], strides = [1, 1]} : vector<8x384xf32> to vector<8x128xf32>
    %48 = arith.addf %46, %47 : vector<8x128xf32>
    %49 = arith.negf %48 : vector<8x128xf32>
    %50 = math.exp %49 : vector<8x128xf32>
    %cst_17 = arith.constant 1.000000e+00 : f32
    %51 = vector.broadcast %cst_17 : f32 to vector<8x128xf32>
    %52 = arith.addf %51, %50 : vector<8x128xf32>
    %53 = arith.divf %51, %52 : vector<8x128xf32>
    %54 = vector.extract_strided_slice %44 {offsets = [0, 128], sizes = [8, 128], strides = [1, 1]} : vector<8x384xf32> to vector<8x128xf32>
    %55 = vector.extract_strided_slice %45 {offsets = [0, 128], sizes = [8, 128], strides = [1, 1]} : vector<8x384xf32> to vector<8x128xf32>
    %56 = arith.addf %54, %55 : vector<8x128xf32>
    %57 = arith.negf %56 : vector<8x128xf32>
    %58 = math.exp %57 : vector<8x128xf32>
    %cst_18 = arith.constant 1.000000e+00 : f32
    %59 = vector.broadcast %cst_18 : f32 to vector<8x128xf32>
    %60 = arith.addf %59, %58 : vector<8x128xf32>
    %61 = arith.divf %59, %60 : vector<8x128xf32>
    %62 = vector.extract_strided_slice %44 {offsets = [0, 256], sizes = [8, 128], strides = [1, 1]} : vector<8x384xf32> to vector<8x128xf32>
    %63 = vector.extract_strided_slice %45 {offsets = [0, 256], sizes = [8, 128], strides = [1, 1]} : vector<8x384xf32> to vector<8x128xf32>
    %64 = vector.broadcast %4 : vector<1x128xf32> to vector<8x128xf32>
    %65 = arith.addf %63, %64 : vector<8x128xf32>
    %66 = arith.mulf %53, %65 : vector<8x128xf32>
    %67 = arith.addf %62, %66 : vector<8x128xf32>
    %68 = math.tanh %67 : vector<8x128xf32>
    %cst_19 = arith.constant 1.000000e+00 : f32
    %69 = vector.broadcast %cst_19 : f32 to vector<8x128xf32>
    %70 = arith.subf %69, %61 : vector<8x128xf32>
    %71 = arith.mulf %70, %68 : vector<8x128xf32>
    %72 = arith.mulf %61, %37 : vector<8x128xf32>
    %73 = arith.addf %71, %72 : vector<8x128xf32>
    %74 = arith.index_cast %c1_i32 : i32 to index
    %c0_20 = arith.constant 0 : index
    %c0_21 = arith.constant 0 : index
    %75 = vector.load %arg5[%74, %c0_20, %c0_21] : memref<8x8x128xf32, #tpu.memory_space<vmem>>, vector<1x8x128xf32>
    %76 = vector.shape_cast %75 : vector<1x8x128xf32> to vector<8x128xf32>
    %77 = vector.shape_cast %73 : vector<8x128xf32> to vector<1x8x128xf32>
    tpu.vector_store %arg5[%74, %c0_20, %c0_21], %77 {strides = array<i32>} : memref<8x8x128xf32, #tpu.memory_space<vmem>>, vector<1x8x128xf32>,
    %c2_i32 = arith.constant 2 : i32
    %78 = arith.index_cast %c2_i32 : i32 to index
    %c0_22 = arith.constant 0 : index
    %c0_23 = arith.constant 0 : index
    %79 = vector.load %arg2[%78, %c0_22, %c0_23] : memref<8x8x384xf32, #tpu.memory_space<vmem>>, vector<1x8x384xf32>
    %80 = vector.shape_cast %79 : vector<1x8x384xf32> to vector<8x384xf32>
    %cst_24 = arith.constant dense<0.000000e+00> : vector<8x384xf32>
    %81 = tpu.matmul %73, %3, %cst_24 {dimension_numbers = #tpu.dot_dimension_numbers<[1], [0], [0], [1], [0, 0, 1, 1], [], []>} : vector<8x128xf32>, vector<128x384xf32>, vector<8x384xf32> -> vector<8x384xf32>
    %82 = vector.extract_strided_slice %80 {offsets = [0, 0], sizes = [8, 128], strides = [1, 1]} : vector<8x384xf32> to vector<8x128xf32>
    %83 = vector.extract_strided_slice %81 {offsets = [0, 0], sizes = [8, 128], strides = [1, 1]} : vector<8x384xf32> to vector<8x128xf32>
    %84 = arith.addf %82, %83 : vector<8x128xf32>
    %85 = arith.negf %84 : vector<8x128xf32>
    %86 = math.exp %85 : vector<8x128xf32>
    %cst_25 = arith.constant 1.000000e+00 : f32
    %87 = vector.broadcast %cst_25 : f32 to vector<8x128xf32>
    %88 = arith.addf %87, %86 : vector<8x128xf32>
    %89 = arith.divf %87, %88 : vector<8x128xf32>
    %90 = vector.extract_strided_slice %80 {offsets = [0, 128], sizes = [8, 128], strides = [1, 1]} : vector<8x384xf32> to vector<8x128xf32>
    %91 = vector.extract_strided_slice %81 {offsets = [0, 128], sizes = [8, 128], strides = [1, 1]} : vector<8x384xf32> to vector<8x128xf32>
    %92 = arith.addf %90, %91 : vector<8x128xf32>
    %93 = arith.negf %92 : vector<8x128xf32>
    %94 = math.exp %93 : vector<8x128xf32>
    %cst_26 = arith.constant 1.000000e+00 : f32
    %95 = vector.broadcast %cst_26 : f32 to vector<8x128xf32>
    %96 = arith.addf %95, %94 : vector<8x128xf32>
    %97 = arith.divf %95, %96 : vector<8x128xf32>
    %98 = vector.extract_strided_slice %80 {offsets = [0, 256], sizes = [8, 128], strides = [1, 1]} : vector<8x384xf32> to vector<8x128xf32>
    %99 = vector.extract_strided_slice %81 {offsets = [0, 256], sizes = [8, 128], strides = [1, 1]} : vector<8x384xf32> to vector<8x128xf32>
    %100 = vector.broadcast %4 : vector<1x128xf32> to vector<8x128xf32>
    %101 = arith.addf %99, %100 : vector<8x128xf32>
    %102 = arith.mulf %89, %101 : vector<8x128xf32>
    %103 = arith.addf %98, %102 : vector<8x128xf32>
    %104 = math.tanh %103 : vector<8x128xf32>
    %cst_27 = arith.constant 1.000000e+00 : f32
    %105 = vector.broadcast %cst_27 : f32 to vector<8x128xf32>
    %106 = arith.subf %105, %97 : vector<8x128xf32>
    %107 = arith.mulf %106, %104 : vector<8x128xf32>
    %108 = arith.mulf %97, %73 : vector<8x128xf32>
    %109 = arith.addf %107, %108 : vector<8x128xf32>
    %110 = arith.index_cast %c2_i32 : i32 to index
    %c0_28 = arith.constant 0 : index
    %c0_29 = arith.constant 0 : index
    %111 = vector.load %arg5[%110, %c0_28, %c0_29] : memref<8x8x128xf32, #tpu.memory_space<vmem>>, vector<1x8x128xf32>
    %112 = vector.shape_cast %111 : vector<1x8x128xf32> to vector<8x128xf32>
    %113 = vector.shape_cast %109 : vector<8x128xf32> to vector<1x8x128xf32>
    tpu.vector_store %arg5[%110, %c0_28, %c0_29], %113 {strides = array<i32>} : memref<8x8x128xf32, #tpu.memory_space<vmem>>, vector<1x8x128xf32>,
    %c3_i32 = arith.constant 3 : i32
    %114 = arith.index_cast %c3_i32 : i32 to index
    %c0_30 = arith.constant 0 : index
    %c0_31 = arith.constant 0 : index
    %115 = vector.load %arg2[%114, %c0_30, %c0_31] : memref<8x8x384xf32, #tpu.memory_space<vmem>>, vector<1x8x384xf32>
    %116 = vector.shape_cast %115 : vector<1x8x384xf32> to vector<8x384xf32>
    %cst_32 = arith.constant dense<0.000000e+00> : vector<8x384xf32>
    %117 = tpu.matmul %109, %3, %cst_32 {dimension_numbers = #tpu.dot_dimension_numbers<[1], [0], [0], [1], [0, 0, 1, 1], [], []>} : vector<8x128xf32>, vector<128x384xf32>, vector<8x384xf32> -> vector<8x384xf32>
    %118 = vector.extract_strided_slice %116 {offsets = [0, 0], sizes = [8, 128], strides = [1, 1]} : vector<8x384xf32> to vector<8x128xf32>
    %119 = vector.extract_strided_slice %117 {offsets = [0, 0], sizes = [8, 128], strides = [1, 1]} : vector<8x384xf32> to vector<8x128xf32>
    %120 = arith.addf %118, %119 : vector<8x128xf32>
    %121 = arith.negf %120 : vector<8x128xf32>
    %122 = math.exp %121 : vector<8x128xf32>
    %cst_33 = arith.constant 1.000000e+00 : f32
    %123 = vector.broadcast %cst_33 : f32 to vector<8x128xf32>
    %124 = arith.addf %123, %122 : vector<8x128xf32>
    %125 = arith.divf %123, %124 : vector<8x128xf32>
    %126 = vector.extract_strided_slice %116 {offsets = [0, 128], sizes = [8, 128], strides = [1, 1]} : vector<8x384xf32> to vector<8x128xf32>
    %127 = vector.extract_strided_slice %117 {offsets = [0, 128], sizes = [8, 128], strides = [1, 1]} : vector<8x384xf32> to vector<8x128xf32>
    %128 = arith.addf %126, %127 : vector<8x128xf32>
    %129 = arith.negf %128 : vector<8x128xf32>
    %130 = math.exp %129 : vector<8x128xf32>
    %cst_34 = arith.constant 1.000000e+00 : f32
    %131 = vector.broadcast %cst_34 : f32 to vector<8x128xf32>
    %132 = arith.addf %131, %130 : vector<8x128xf32>
    %133 = arith.divf %131, %132 : vector<8x128xf32>
    %134 = vector.extract_strided_slice %116 {offsets = [0, 256], sizes = [8, 128], strides = [1, 1]} : vector<8x384xf32> to vector<8x128xf32>
    %135 = vector.extract_strided_slice %117 {offsets = [0, 256], sizes = [8, 128], strides = [1, 1]} : vector<8x384xf32> to vector<8x128xf32>
    %136 = vector.broadcast %4 : vector<1x128xf32> to vector<8x128xf32>
    %137 = arith.addf %135, %136 : vector<8x128xf32>
    %138 = arith.mulf %125, %137 : vector<8x128xf32>
    %139 = arith.addf %134, %138 : vector<8x128xf32>
    %140 = math.tanh %139 : vector<8x128xf32>
    %cst_35 = arith.constant 1.000000e+00 : f32
    %141 = vector.broadcast %cst_35 : f32 to vector<8x128xf32>
    %142 = arith.subf %141, %133 : vector<8x128xf32>
    %143 = arith.mulf %142, %140 : vector<8x128xf32>
    %144 = arith.mulf %133, %109 : vector<8x128xf32>
    %145 = arith.addf %143, %144 : vector<8x128xf32>
    %146 = arith.index_cast %c3_i32 : i32 to index
    %c0_36 = arith.constant 0 : index
    %c0_37 = arith.constant 0 : index
    %147 = vector.load %arg5[%146, %c0_36, %c0_37] : memref<8x8x128xf32, #tpu.memory_space<vmem>>, vector<1x8x128xf32>
    %148 = vector.shape_cast %147 : vector<1x8x128xf32> to vector<8x128xf32>
    %149 = vector.shape_cast %145 : vector<8x128xf32> to vector<1x8x128xf32>
    tpu.vector_store %arg5[%146, %c0_36, %c0_37], %149 {strides = array<i32>} : memref<8x8x128xf32, #tpu.memory_space<vmem>>, vector<1x8x128xf32>,
    %c4_i32 = arith.constant 4 : i32
    %150 = arith.index_cast %c4_i32 : i32 to index
    %c0_38 = arith.constant 0 : index
    %c0_39 = arith.constant 0 : index
    %151 = vector.load %arg2[%150, %c0_38, %c0_39] : memref<8x8x384xf32, #tpu.memory_space<vmem>>, vector<1x8x384xf32>
    %152 = vector.shape_cast %151 : vector<1x8x384xf32> to vector<8x384xf32>
    %cst_40 = arith.constant dense<0.000000e+00> : vector<8x384xf32>
    %153 = tpu.matmul %145, %3, %cst_40 {dimension_numbers = #tpu.dot_dimension_numbers<[1], [0], [0], [1], [0, 0, 1, 1], [], []>} : vector<8x128xf32>, vector<128x384xf32>, vector<8x384xf32> -> vector<8x384xf32>
    %154 = vector.extract_strided_slice %152 {offsets = [0, 0], sizes = [8, 128], strides = [1, 1]} : vector<8x384xf32> to vector<8x128xf32>
    %155 = vector.extract_strided_slice %153 {offsets = [0, 0], sizes = [8, 128], strides = [1, 1]} : vector<8x384xf32> to vector<8x128xf32>
    %156 = arith.addf %154, %155 : vector<8x128xf32>
    %157 = arith.negf %156 : vector<8x128xf32>
    %158 = math.exp %157 : vector<8x128xf32>
    %cst_41 = arith.constant 1.000000e+00 : f32
    %159 = vector.broadcast %cst_41 : f32 to vector<8x128xf32>
    %160 = arith.addf %159, %158 : vector<8x128xf32>
    %161 = arith.divf %159, %160 : vector<8x128xf32>
    %162 = vector.extract_strided_slice %152 {offsets = [0, 128], sizes = [8, 128], strides = [1, 1]} : vector<8x384xf32> to vector<8x128xf32>
    %163 = vector.extract_strided_slice %153 {offsets = [0, 128], sizes = [8, 128], strides = [1, 1]} : vector<8x384xf32> to vector<8x128xf32>
    %164 = arith.addf %162, %163 : vector<8x128xf32>
    %165 = arith.negf %164 : vector<8x128xf32>
    %166 = math.exp %165 : vector<8x128xf32>
    %cst_42 = arith.constant 1.000000e+00 : f32
    %167 = vector.broadcast %cst_42 : f32 to vector<8x128xf32>
    %168 = arith.addf %167, %166 : vector<8x128xf32>
    %169 = arith.divf %167, %168 : vector<8x128xf32>
    %170 = vector.extract_strided_slice %152 {offsets = [0, 256], sizes = [8, 128], strides = [1, 1]} : vector<8x384xf32> to vector<8x128xf32>
    %171 = vector.extract_strided_slice %153 {offsets = [0, 256], sizes = [8, 128], strides = [1, 1]} : vector<8x384xf32> to vector<8x128xf32>
    %172 = vector.broadcast %4 : vector<1x128xf32> to vector<8x128xf32>
    %173 = arith.addf %171, %172 : vector<8x128xf32>
    %174 = arith.mulf %161, %173 : vector<8x128xf32>
    %175 = arith.addf %170, %174 : vector<8x128xf32>
    %176 = math.tanh %175 : vector<8x128xf32>
    %cst_43 = arith.constant 1.000000e+00 : f32
    %177 = vector.broadcast %cst_43 : f32 to vector<8x128xf32>
    %178 = arith.subf %177, %169 : vector<8x128xf32>
    %179 = arith.mulf %178, %176 : vector<8x128xf32>
    %180 = arith.mulf %169, %145 : vector<8x128xf32>
    %181 = arith.addf %179, %180 : vector<8x128xf32>
    %182 = arith.index_cast %c4_i32 : i32 to index
    %c0_44 = arith.constant 0 : index
    %c0_45 = arith.constant 0 : index
    %183 = vector.load %arg5[%182, %c0_44, %c0_45] : memref<8x8x128xf32, #tpu.memory_space<vmem>>, vector<1x8x128xf32>
    %184 = vector.shape_cast %183 : vector<1x8x128xf32> to vector<8x128xf32>
    %185 = vector.shape_cast %181 : vector<8x128xf32> to vector<1x8x128xf32>
    tpu.vector_store %arg5[%182, %c0_44, %c0_45], %185 {strides = array<i32>} : memref<8x8x128xf32, #tpu.memory_space<vmem>>, vector<1x8x128xf32>,
    %c5_i32 = arith.constant 5 : i32
    %186 = arith.index_cast %c5_i32 : i32 to index
    %c0_46 = arith.constant 0 : index
    %c0_47 = arith.constant 0 : index
    %187 = vector.load %arg2[%186, %c0_46, %c0_47] : memref<8x8x384xf32, #tpu.memory_space<vmem>>, vector<1x8x384xf32>
    %188 = vector.shape_cast %187 : vector<1x8x384xf32> to vector<8x384xf32>
    %cst_48 = arith.constant dense<0.000000e+00> : vector<8x384xf32>
    %189 = tpu.matmul %181, %3, %cst_48 {dimension_numbers = #tpu.dot_dimension_numbers<[1], [0], [0], [1], [0, 0, 1, 1], [], []>} : vector<8x128xf32>, vector<128x384xf32>, vector<8x384xf32> -> vector<8x384xf32>
    %190 = vector.extract_strided_slice %188 {offsets = [0, 0], sizes = [8, 128], strides = [1, 1]} : vector<8x384xf32> to vector<8x128xf32>
    %191 = vector.extract_strided_slice %189 {offsets = [0, 0], sizes = [8, 128], strides = [1, 1]} : vector<8x384xf32> to vector<8x128xf32>
    %192 = arith.addf %190, %191 : vector<8x128xf32>
    %193 = arith.negf %192 : vector<8x128xf32>
    %194 = math.exp %193 : vector<8x128xf32>
    %cst_49 = arith.constant 1.000000e+00 : f32
    %195 = vector.broadcast %cst_49 : f32 to vector<8x128xf32>
    %196 = arith.addf %195, %194 : vector<8x128xf32>
    %197 = arith.divf %195, %196 : vector<8x128xf32>
    %198 = vector.extract_strided_slice %188 {offsets = [0, 128], sizes = [8, 128], strides = [1, 1]} : vector<8x384xf32> to vector<8x128xf32>
    %199 = vector.extract_strided_slice %189 {offsets = [0, 128], sizes = [8, 128], strides = [1, 1]} : vector<8x384xf32> to vector<8x128xf32>
    %200 = arith.addf %198, %199 : vector<8x128xf32>
    %201 = arith.negf %200 : vector<8x128xf32>
    %202 = math.exp %201 : vector<8x128xf32>
    %cst_50 = arith.constant 1.000000e+00 : f32
    %203 = vector.broadcast %cst_50 : f32 to vector<8x128xf32>
    %204 = arith.addf %203, %202 : vector<8x128xf32>
    %205 = arith.divf %203, %204 : vector<8x128xf32>
    %206 = vector.extract_strided_slice %188 {offsets = [0, 256], sizes = [8, 128], strides = [1, 1]} : vector<8x384xf32> to vector<8x128xf32>
    %207 = vector.extract_strided_slice %189 {offsets = [0, 256], sizes = [8, 128], strides = [1, 1]} : vector<8x384xf32> to vector<8x128xf32>
    %208 = vector.broadcast %4 : vector<1x128xf32> to vector<8x128xf32>
    %209 = arith.addf %207, %208 : vector<8x128xf32>
    %210 = arith.mulf %197, %209 : vector<8x128xf32>
    %211 = arith.addf %206, %210 : vector<8x128xf32>
    %212 = math.tanh %211 : vector<8x128xf32>
    %cst_51 = arith.constant 1.000000e+00 : f32
    %213 = vector.broadcast %cst_51 : f32 to vector<8x128xf32>
    %214 = arith.subf %213, %205 : vector<8x128xf32>
    %215 = arith.mulf %214, %212 : vector<8x128xf32>
    %216 = arith.mulf %205, %181 : vector<8x128xf32>
    %217 = arith.addf %215, %216 : vector<8x128xf32>
    %218 = arith.index_cast %c5_i32 : i32 to index
    %c0_52 = arith.constant 0 : index
    %c0_53 = arith.constant 0 : index
    %219 = vector.load %arg5[%218, %c0_52, %c0_53] : memref<8x8x128xf32, #tpu.memory_space<vmem>>, vector<1x8x128xf32>
    %220 = vector.shape_cast %219 : vector<1x8x128xf32> to vector<8x128xf32>
    %221 = vector.shape_cast %217 : vector<8x128xf32> to vector<1x8x128xf32>
    tpu.vector_store %arg5[%218, %c0_52, %c0_53], %221 {strides = array<i32>} : memref<8x8x128xf32, #tpu.memory_space<vmem>>, vector<1x8x128xf32>,
    %c6_i32 = arith.constant 6 : i32
    %222 = arith.index_cast %c6_i32 : i32 to index
    %c0_54 = arith.constant 0 : index
    %c0_55 = arith.constant 0 : index
    %223 = vector.load %arg2[%222, %c0_54, %c0_55] : memref<8x8x384xf32, #tpu.memory_space<vmem>>, vector<1x8x384xf32>
    %224 = vector.shape_cast %223 : vector<1x8x384xf32> to vector<8x384xf32>
    %cst_56 = arith.constant dense<0.000000e+00> : vector<8x384xf32>
    %225 = tpu.matmul %217, %3, %cst_56 {dimension_numbers = #tpu.dot_dimension_numbers<[1], [0], [0], [1], [0, 0, 1, 1], [], []>} : vector<8x128xf32>, vector<128x384xf32>, vector<8x384xf32> -> vector<8x384xf32>
    %226 = vector.extract_strided_slice %224 {offsets = [0, 0], sizes = [8, 128], strides = [1, 1]} : vector<8x384xf32> to vector<8x128xf32>
    %227 = vector.extract_strided_slice %225 {offsets = [0, 0], sizes = [8, 128], strides = [1, 1]} : vector<8x384xf32> to vector<8x128xf32>
    %228 = arith.addf %226, %227 : vector<8x128xf32>
    %229 = arith.negf %228 : vector<8x128xf32>
    %230 = math.exp %229 : vector<8x128xf32>
    %cst_57 = arith.constant 1.000000e+00 : f32
    %231 = vector.broadcast %cst_57 : f32 to vector<8x128xf32>
    %232 = arith.addf %231, %230 : vector<8x128xf32>
    %233 = arith.divf %231, %232 : vector<8x128xf32>
    %234 = vector.extract_strided_slice %224 {offsets = [0, 128], sizes = [8, 128], strides = [1, 1]} : vector<8x384xf32> to vector<8x128xf32>
    %235 = vector.extract_strided_slice %225 {offsets = [0, 128], sizes = [8, 128], strides = [1, 1]} : vector<8x384xf32> to vector<8x128xf32>
    %236 = arith.addf %234, %235 : vector<8x128xf32>
    %237 = arith.negf %236 : vector<8x128xf32>
    %238 = math.exp %237 : vector<8x128xf32>
    %cst_58 = arith.constant 1.000000e+00 : f32
    %239 = vector.broadcast %cst_58 : f32 to vector<8x128xf32>
    %240 = arith.addf %239, %238 : vector<8x128xf32>
    %241 = arith.divf %239, %240 : vector<8x128xf32>
    %242 = vector.extract_strided_slice %224 {offsets = [0, 256], sizes = [8, 128], strides = [1, 1]} : vector<8x384xf32> to vector<8x128xf32>
    %243 = vector.extract_strided_slice %225 {offsets = [0, 256], sizes = [8, 128], strides = [1, 1]} : vector<8x384xf32> to vector<8x128xf32>
    %244 = vector.broadcast %4 : vector<1x128xf32> to vector<8x128xf32>
    %245 = arith.addf %243, %244 : vector<8x128xf32>
    %246 = arith.mulf %233, %245 : vector<8x128xf32>
    %247 = arith.addf %242, %246 : vector<8x128xf32>
    %248 = math.tanh %247 : vector<8x128xf32>
    %cst_59 = arith.constant 1.000000e+00 : f32
    %249 = vector.broadcast %cst_59 : f32 to vector<8x128xf32>
    %250 = arith.subf %249, %241 : vector<8x128xf32>
    %251 = arith.mulf %250, %248 : vector<8x128xf32>
    %252 = arith.mulf %241, %217 : vector<8x128xf32>
    %253 = arith.addf %251, %252 : vector<8x128xf32>
    %254 = arith.index_cast %c6_i32 : i32 to index
    %c0_60 = arith.constant 0 : index
    %c0_61 = arith.constant 0 : index
    %255 = vector.load %arg5[%254, %c0_60, %c0_61] : memref<8x8x128xf32, #tpu.memory_space<vmem>>, vector<1x8x128xf32>
    %256 = vector.shape_cast %255 : vector<1x8x128xf32> to vector<8x128xf32>
    %257 = vector.shape_cast %253 : vector<8x128xf32> to vector<1x8x128xf32>
    tpu.vector_store %arg5[%254, %c0_60, %c0_61], %257 {strides = array<i32>} : memref<8x8x128xf32, #tpu.memory_space<vmem>>, vector<1x8x128xf32>,
    %c7_i32 = arith.constant 7 : i32
    %258 = arith.index_cast %c7_i32 : i32 to index
    %c0_62 = arith.constant 0 : index
    %c0_63 = arith.constant 0 : index
    %259 = vector.load %arg2[%258, %c0_62, %c0_63] : memref<8x8x384xf32, #tpu.memory_space<vmem>>, vector<1x8x384xf32>
    %260 = vector.shape_cast %259 : vector<1x8x384xf32> to vector<8x384xf32>
    %cst_64 = arith.constant dense<0.000000e+00> : vector<8x384xf32>
    %261 = tpu.matmul %253, %3, %cst_64 {dimension_numbers = #tpu.dot_dimension_numbers<[1], [0], [0], [1], [0, 0, 1, 1], [], []>} : vector<8x128xf32>, vector<128x384xf32>, vector<8x384xf32> -> vector<8x384xf32>
    %262 = vector.extract_strided_slice %260 {offsets = [0, 0], sizes = [8, 128], strides = [1, 1]} : vector<8x384xf32> to vector<8x128xf32>
    %263 = vector.extract_strided_slice %261 {offsets = [0, 0], sizes = [8, 128], strides = [1, 1]} : vector<8x384xf32> to vector<8x128xf32>
    %264 = arith.addf %262, %263 : vector<8x128xf32>
    %265 = arith.negf %264 : vector<8x128xf32>
    %266 = math.exp %265 : vector<8x128xf32>
    %cst_65 = arith.constant 1.000000e+00 : f32
    %267 = vector.broadcast %cst_65 : f32 to vector<8x128xf32>
    %268 = arith.addf %267, %266 : vector<8x128xf32>
    %269 = arith.divf %267, %268 : vector<8x128xf32>
    %270 = vector.extract_strided_slice %260 {offsets = [0, 128], sizes = [8, 128], strides = [1, 1]} : vector<8x384xf32> to vector<8x128xf32>
    %271 = vector.extract_strided_slice %261 {offsets = [0, 128], sizes = [8, 128], strides = [1, 1]} : vector<8x384xf32> to vector<8x128xf32>
    %272 = arith.addf %270, %271 : vector<8x128xf32>
    %273 = arith.negf %272 : vector<8x128xf32>
    %274 = math.exp %273 : vector<8x128xf32>
    %cst_66 = arith.constant 1.000000e+00 : f32
    %275 = vector.broadcast %cst_66 : f32 to vector<8x128xf32>
    %276 = arith.addf %275, %274 : vector<8x128xf32>
    %277 = arith.divf %275, %276 : vector<8x128xf32>
    %278 = vector.extract_strided_slice %260 {offsets = [0, 256], sizes = [8, 128], strides = [1, 1]} : vector<8x384xf32> to vector<8x128xf32>
    %279 = vector.extract_strided_slice %261 {offsets = [0, 256], sizes = [8, 128], strides = [1, 1]} : vector<8x384xf32> to vector<8x128xf32>
    %280 = vector.broadcast %4 : vector<1x128xf32> to vector<8x128xf32>
    %281 = arith.addf %279, %280 : vector<8x128xf32>
    %282 = arith.mulf %269, %281 : vector<8x128xf32>
    %283 = arith.addf %278, %282 : vector<8x128xf32>
    %284 = math.tanh %283 : vector<8x128xf32>
    %cst_67 = arith.constant 1.000000e+00 : f32
    %285 = vector.broadcast %cst_67 : f32 to vector<8x128xf32>
    %286 = arith.subf %285, %277 : vector<8x128xf32>
    %287 = arith.mulf %286, %284 : vector<8x128xf32>
    %288 = arith.mulf %277, %253 : vector<8x128xf32>
    %289 = arith.addf %287, %288 : vector<8x128xf32>
    %290 = arith.index_cast %c7_i32 : i32 to index
    %c0_68 = arith.constant 0 : index
    %c0_69 = arith.constant 0 : index
    %291 = vector.load %arg5[%290, %c0_68, %c0_69] : memref<8x8x128xf32, #tpu.memory_space<vmem>>, vector<1x8x128xf32>
    %292 = vector.shape_cast %291 : vector<1x8x128xf32> to vector<8x128xf32>
    %293 = vector.shape_cast %289 : vector<8x128xf32> to vector<1x8x128xf32>
    tpu.vector_store %arg5[%290, %c0_68, %c0_69], %293 {strides = array<i32>} : memref<8x8x128xf32, #tpu.memory_space<vmem>>, vector<1x8x128xf32>,
    %c8_i32 = arith.constant 8 : i32
    %c0_70 = arith.constant 0 : index
    %c0_71 = arith.constant 0 : index
    %294 = vector.load %arg6[%c0_70, %c0_71] : memref<8x128xf32, #tpu.memory_space<vmem>>, vector<8x128xf32>
    tpu.vector_store %arg6[%c0_70, %c0_71], %289 {strides = array<i32>} : memref<8x128xf32, #tpu.memory_space<vmem>>, vector<8x128xf32>,
    return
  }
  func.func @transform_0(%arg0: i32, %arg1: i32) -> (i32, i32, i32) {
    %c0_i32 = arith.constant 0 : i32
    %c0_i32_0 = arith.constant 0 : i32
    return %arg1, %arg0, %c0_i32 : i32, i32, i32
  }
  func.func @transform_1(%arg0: i32, %arg1: i32) -> (i32, i32) {
    %c0_i32 = arith.constant 0 : i32
    %c0_i32_0 = arith.constant 0 : i32
    %c0_i32_1 = arith.constant 0 : i32
    return %c0_i32, %c0_i32_0 : i32, i32
  }
  func.func @transform_2(%arg0: i32, %arg1: i32) -> (i32, i32) {
    %c0_i32 = arith.constant 0 : i32
    %c0_i32_0 = arith.constant 0 : i32
    %c0_i32_1 = arith.constant 0 : i32
    return %c0_i32, %c0_i32_0 : i32, i32
  }
  func.func @transform_3(%arg0: i32, %arg1: i32) -> (i32, i32, i32) {
    %c0_i32 = arith.constant 0 : i32
    %c0_i32_0 = arith.constant 0 : i32
    return %arg1, %arg0, %c0_i32 : i32, i32, i32
  }
}

</mosaic_0001>

<bundles_post_ra>
// kernel: tpu_custom_call.1
= control target key start
LH: loop header
LB: loop body
LE: loop exit
PB: predicated region body
PF: predicated region fallthrough
CT: control target
= control target key end

     0   :  { %8 = vsyncpa [#allocation4], 0  ;;  %s2961_s0 = inlined_call_operand.hbm [shape: f32[8,8,384], index: 0, kind: input, shape index: {}]   ;;  %s2962_s1 = inlined_call_operand.hbm [shape: f32[128,384], index: 1, kind: input, shape index: {}]   ;;  %s2963_s2 = inlined_call_operand.vmem [shape: f32[1,128], index: 2, kind: input, shape index: {}]   ;;  %s2964_s3 = inlined_call_operand.hbm [shape: f32[8,8,128], index: 3, kind: output, shape index: {}]  }
   0x1   :  { %9 = vsyncpa [#allocation7], 0 }
   0x2   :  { %10 = vsyncpa [#allocation5], 0  ;;  %s2516_s12 = smov [#allocation3]   ;;  %s2444_s16 = scalar_lea.hbm %s2961_s0, 3072 }
   0x3   :  { %s16_s13 = sshll.u32 %s2516_s12, 4  ;;  %p2445_p0 = scmp.ne.s32.totalorder %s2961_s0, %s2444_s16  ;;  %s17_s13 = int_to_ptr.vmem [resolvable:$true] %s16_s13 }
   0x4   :  { %p2448_p1 = scmp.lt.u32.totalorder %s2444_s16, %s2961_s0 }
   0x6   :  { %p2450_p2 = pnand %p2448_p1, %p2445_p0 }
   0x8   :  { %2453 = shalt.err (!%p2450_p2)
}
   0x9   :  { %s2454_s21 = scalar_lea.vmem %s17_s13, 3072  ;;  %p2459_p4 = scmp.lt.s32.totalorder %s17_s13, %s17_s13 }
   0xa   :  { %p2455_p3 = scmp.ne.s32.totalorder %s17_s13, %s2454_s21  ;;  %p2460_p5 = scmp.lt.s32.totalorder %s2454_s21, %s2454_s21 }
   0xc   :  { %p2461_p6 = por %p2460_p5, %p2459_p4 }
   0xe   :  { %p2462_p7 = pnand %p2461_p6, %p2455_p3 }
  0x10   :  { %2465 = shalt.err (!%p2462_p7)
}
  0x11   :  { %s2517_s22 = smov 384   ;;  %s2518_s23 = smov 24  }
  0x12   :  { %22 = dma.hbm_to_vmem [thread:$0]  %s2961_s0, 3072, %s17_s13, [#allocation4], %s2517_s22, %s2517_s22, %s2518_s23  }
  0x13   :  { %s2519_s26 = smov [#allocation6]   ;;  %s2466_s30 = scalar_lea.hbm %s2962_s1, 6144 }
  0x14   :  { %s28_s27 = sshll.u32 %s2519_s26, 4  ;;  %p2467_p8 = scmp.ne.s32.totalorder %s2962_s1, %s2466_s30  ;;  %s29_s27 = int_to_ptr.vmem [resolvable:$true] %s28_s27 }
  0x15   :  { %p2470_p9 = scmp.lt.u32.totalorder %s2466_s30, %s2962_s1 }
  0x17   :  { %p2472_p10 = pnand %p2470_p9, %p2467_p8 }
  0x19   :  { %2475 = shalt.err (!%p2472_p10)
}
  0x1a   :  { %s2476_s8 = scalar_lea.vmem %s29_s27, 6144  ;;  %p2481_p12 = scmp.lt.s32.totalorder %s29_s27, %s29_s27 }
  0x1b   :  { %p2477_p11 = scmp.ne.s32.totalorder %s29_s27, %s2476_s8  ;;  %p2482_p13 = scmp.lt.s32.totalorder %s2476_s8, %s2476_s8 }
  0x1d   :  { %p2483_p0 = por %p2482_p13, %p2481_p12 }
  0x1f   :  { %p2484_p1 = pnand %p2483_p0, %p2477_p11 }
  0x21   :  { %2487 = shalt.err (!%p2484_p1)
}
  0x22   :  { %34 = dma.hbm_to_vmem [thread:$0]  %s2962_s1, 6144, %s29_s27, [#allocation7], %s2517_s22, %s2517_s22, %s2518_s23  }
  0x23   :  { %2510 = dma.done.wait [#allocation4], 3072  }
  0x24   :  { %2511 = vsyncadd [#allocation4], 4294964224 }
  0x25   :  { %2512 = dma.done.wait [#allocation7], 6144  }
  0x26   :  { %2513 = vsyncadd [#allocation7], 4294961152  ;;  %v2520_v0 = vmov 0.0|0.0   ;;  %v2521_v1 = vmov 0.0   ;;  %vm2522_vm0 = vmmov 0   ;;  %v49_v2 = vld [vmem:[#allocation6 + $0x8] sm:$0xff] }
  0x27   :  { %1938 = vmatprep.subr.bf16.mxu1 %v2520_v0  ;;  %165 = vmatprep.mubr.f32.mxu0 %v2521_v1  ;;  %v52_v3 = vld [vmem:[#allocation6 + $0x20] sm:$0xff]  ;;  %v51_v6 = vld [vmem:[#allocation6 + $0x18] sm:$0xff]  ;;  %v58_v8 = vld [vmem:[#allocation6 + $0x50] sm:$0xff] }
  0x28   :  { %1658 = vmatprep.mubr.msk.f32.mxu1 %vm2522_vm0, %v2521_v1  ;;  %v48_v4 = vld [vmem:[#allocation6] sm:$0xff]  ;;  %v2574_v5 = vpack.c.bf16 %v52_v3, %v49_v2  ;;  %v55_v7 = vld [vmem:[#allocation6 + $0x38] sm:$0xff]  ;;  %v54_v11 = vld [vmem:[#allocation6 + $0x30] sm:$0xff] }
  0x29   :  { %v2576_v9 = vpack.c.bf16 %v51_v6, %v48_v4  ;;  %v2578_v10 = vpack.c.bf16 %v58_v8, %v55_v7  ;;  %v57_v12 = vld [vmem:[#allocation6 + $0x48] sm:$0xff]  ;;  %v64_v14 = vld [vmem:[#allocation6 + $0x80] sm:$0xff]  ;;  %v63_v18 = vld [vmem:[#allocation6 + $0x78] sm:$0xff] }
  0x2a   :  { %v61_v13 = vld [vmem:[#allocation6 + $0x68] sm:$0xff]  ;;  %1907 = vmatprep.subr.bf16.mxu0 %v2574_v5  ;;  %v2582_v15 = vpack.c.bf16 %v57_v12, %v54_v11  ;;  %v60_v17 = vld [vmem:[#allocation6 + $0x60] sm:$0xff]  ;;  %v67_v19 = vld [vmem:[#allocation6 + $0x98] sm:$0xff] }
  0x2b   :  { %1909 = vmatpush1.bf16.msra.mxu0 %v2576_v9  ;;  %v2585_v16 = vpack.c.bf16 %v64_v14, %v61_v13  ;;  %v70_v20 = vld [vmem:[#allocation6 + $0xb0] sm:$0xff]  ;;  %v2588_v21 = vpack.c.bf16 %v63_v18, %v60_v17  ;;  %v69_v24 = vld [vmem:[#allocation6 + $0xa8] sm:$0xff]  ;;  %v76_v28 = vld [vmem:[#allocation6 + $0xe0] sm:$0xff] }
  0x2c   :  { %1911 = vmatprep.subr.bf16.mxu0 %v2578_v10  ;;  %v66_v22 = vld [vmem:[#allocation6 + $0x90] sm:$0xff]  ;;  %v2591_v23 = vpack.c.bf16 %v70_v20, %v67_v19  ;;  %v53_v26 = vld [vmem:[#allocation6 + $0x28] sm:$0xff]  ;;  %v56_v30 = vld [vmem:[#allocation6 + $0x40] sm:$0xff] }
  0x2d   :  { %v50_v25 = vld [vmem:[#allocation6 + $0x10] sm:$0xff]  ;;  %v73_v27 = vld [vmem:[#allocation6 + $0xc8] sm:$0xff]  ;;  %v59_v31 = vld [vmem:[#allocation6 + $0x58] sm:$0xff]  ;;  %v2596_v32 = vpack.c.bf16 %v69_v24, %v66_v22 }
  0x2e   :  { %v2593_v29 = vpack.c.bf16 %v53_v26, %v50_v25  ;;  %v72_v33 = vld [vmem:[#allocation6 + $0xc0] sm:$0xff]  ;;  %v2599_v34 = vpack.c.bf16 %v59_v31, %v56_v30  ;;  %v2602_v35 = vpack.c.bf16 %v76_v28, %v73_v27  ;;  %v75_v36 = vld [vmem:[#allocation6 + $0xd8] sm:$0xff]  ;;  %v62_v37 = vld [vmem:[#allocation6 + $0x70] sm:$0xff] }
  0x2f   :  { %1913 = vmatpush1.bf16.msra.mxu0 %v2582_v15  ;;  %v65_v38 = vld [vmem:[#allocation6 + $0x88] sm:$0xff]  ;;  %v79_v39 = vld [vmem:[#allocation6 + $0xf8] sm:$0xff]  ;;  %v82_v40 = vld [vmem:[#allocation6 + $0x110] sm:$0xff]  ;;  %v2606_v41 = vpack.c.bf16 %v75_v36, %v72_v33 }
  0x30   :  { %1915 = vmatprep.subr.bf16.mxu0 %v2585_v16  ;;  %1940 = vmatpush3.bf16.msra.mxu1 %v2593_v29  ;;  %v78_v42 = vld [vmem:[#allocation6 + $0xf0] sm:$0xff]  ;;  %v2609_v43 = vpack.c.bf16 %v65_v38, %v62_v37  ;;  %v2612_v44 = vpack.c.bf16 %v82_v40, %v79_v39  ;;  %v81_v45 = vld [vmem:[#allocation6 + $0x108] sm:$0xff]  ;;  %v68_v46 = vld [vmem:[#allocation6 + $0xa0] sm:$0xff] }
  0x31   :  { %1941 = vmatprep.subr.bf16.mxu1 %v2520_v0  ;;  %v71_v47 = vld [vmem:[#allocation6 + $0xb8] sm:$0xff]  ;;  %v85_v48 = vld [vmem:[#allocation6 + $0x128] sm:$0xff]  ;;  %v88_v49 = vld [vmem:[#allocation6 + $0x140] sm:$0xff]  ;;  %v2616_v50 = vpack.c.bf16 %v81_v45, %v78_v42 }
  0x32   :  { %v84_v51 = vld [vmem:[#allocation6 + $0x120] sm:$0xff]  ;;  %v2619_v52 = vpack.c.bf16 %v71_v47, %v68_v46  ;;  %v2622_v53 = vpack.c.bf16 %v88_v49, %v85_v48  ;;  %v87_v54 = vld [vmem:[#allocation6 + $0x138] sm:$0xff]  ;;  %v74_v55 = vld [vmem:[#allocation6 + $0xd0] sm:$0xff] }
  0x33   :  { %1917 = vmatpush1.bf16.msra.mxu0 %v2588_v21  ;;  %v77_v56 = vld [vmem:[#allocation6 + $0xe8] sm:$0xff]  ;;  %v91_v57 = vld [vmem:[#allocation6 + $0x158] sm:$0xff]  ;;  %v94_v58 = vld [vmem:[#allocation6 + $0x170] sm:$0xff]  ;;  %v2626_v59 = vpack.c.bf16 %v87_v54, %v84_v51 }
  0x34   :  { %1919 = vmatprep.subr.bf16.mxu0 %v2591_v23  ;;  %1943 = vmatpush3.bf16.msra.mxu1 %v2599_v34  ;;  %v90_v60 = vld [vmem:[#allocation6 + $0x150] sm:$0xff]  ;;  %v2629_v61 = vpack.c.bf16 %v77_v56, %v74_v55  ;;  %v2632_v62 = vpack.c.bf16 %v94_v58, %v91_v57  ;;  %v93_v63 = vld [vmem:[#allocation6 + $0x168] sm:$0xff]  ;;  %v80_v2 = vld [vmem:[#allocation6 + $0x100] sm:$0xff] }
  0x35   :  { %1944 = vmatprep.subr.bf16.mxu1 %v2520_v0  ;;  %v83_v3 = vld [vmem:[#allocation6 + $0x118] sm:$0xff]  ;;  %v2636_v4 = vpack.c.bf16 %v93_v63, %v90_v60  ;;  %v86_v7 = vld [vmem:[#allocation6 + $0x130] sm:$0xff]  ;;  %v89_v8 = vld [vmem:[#allocation6 + $0x148] sm:$0xff] }
  0x36   :  { %v2639_v6 = vpack.c.bf16 %v83_v3, %v80_v2  ;;  %v2645_v11 = vpack.c.bf16 %v89_v8, %v86_v7  ;;  %v92_v12 = vld [vmem:[#allocation6 + $0x160] sm:$0xff]  ;;  %v95_v13 = vld [vmem:[#allocation6 + $0x178] sm:$0xff]  ;;  %v99_v20 = vld [vmem:[#allocation3 + $0x8] sm:$0xff] }
  0x37   :  { %1921 = vmatpush1.bf16.msra.mxu0 %v2596_v32  ;;  %v2651_v14 = vpack.c.bf16 %v95_v13, %v92_v12  ;;  %v98_v17 = vld [vmem:[#allocation3] sm:$0xff]  ;;  %v100_v40 = vld [vmem:[#allocation3 + $0x10] sm:$0xff]  ;;  %v272_v55 = vld [vmem:[#allocation3 + $0x18] sm:$0xff] }
  0x38   :  { %1923 = vmatprep.subr.bf16.mxu0 %v2602_v35  ;;  %1946 = vmatpush3.bf16.msra.mxu1 %v2609_v43  ;;  %v2695_v36 = vld [vmem:[%s2963_s2] ss:$0 sm:$0xff]  ;;  %s2523_s2 = smov [#allocation8]  }
  0x39   :  { %1947 = vmatprep.subr.bf16.mxu1 %v2520_v0  ;;  %v273_v60 = vld [vmem:[#allocation3 + $0x20] sm:$0xff]  ;;  %s1460_s11 = sshll.u32 %s2523_s2, 4  ;;  %s1461_s11 = int_to_ptr.vmem [resolvable:$true] %s1460_s11 }
  0x3a   :  { %s2488_s12 = scalar_lea.vmem %s1461_s11, 1024  ;;  %p2493_p3 = scmp.lt.s32.totalorder %s1461_s11, %s1461_s11 }
  0x3b   :  { %1925 = vmatpush1.bf16.msra.mxu0 %v2606_v41  ;;  %p2489_p2 = scmp.ne.s32.totalorder %s1461_s11, %s2488_s12  ;;  %p2494_p4 = scmp.lt.s32.totalorder %s2488_s12, %s2488_s12 }
  0x3c   :  { %1927 = vmatprep.subr.bf16.mxu0 %v2612_v44  ;;  %1949 = vmatpush3.bf16.msra.mxu1 %v2619_v52 }
  0x3d   :  { %1950 = vmatprep.subr.bf16.mxu1 %v2520_v0  ;;  %p2495_p5 = por %p2494_p4, %p2493_p3 }
  0x3f   :  { %1929 = vmatpush1.bf16.msra.mxu0 %v2616_v50  ;;  %p2496_p6 = pnand %p2495_p5, %p2489_p2 }
  0x40   :  { %1931 = vmatprep.subr.bf16.mxu0 %v2622_v53  ;;  %1952 = vmatpush3.bf16.msra.mxu1 %v2629_v61 }
  0x41   :  { %1953 = vmatprep.subr.bf16.mxu1 %v2520_v0 }
  0x43   :  { %1933 = vmatpush1.bf16.msra.mxu0 %v2626_v59 }
  0x44   :  { %1935 = vmatprep.subr.bf16.mxu0 %v2632_v62  ;;  %1955 = vmatpush3.bf16.msra.mxu1 %v2639_v6 }
  0x45   :  { %1956 = vmatprep.subr.bf16.mxu1 %v2520_v0 }
  0x47   :  { %1937 = vmatpush1.bf16.msra.mxu0 %v2636_v4 }
  0x48   :  { %1963 = vmatprep.subr.bf16.mxu0 %v2574_v5  ;;  %1958 = vmatpush3.bf16.msra.mxu1 %v2645_v11 }
  0x49   :  { %1959 = vmatprep.subr.bf16.mxu1 %v2520_v0 }
  0x4a   :  { %166 = vmatmul.mubr.f32.vlgmr.msra.gmra.mrb[0].mxu0 %v2521_v1 }
  0x4b   :  { %1965 = vmatpush1.bf16.msra.mxu0 %v2576_v9  ;;  %339 = vmatprep.mubr.f32.mxu0 %v2521_v1 }
  0x4c   :  { %1967 = vmatprep.subr.bf16.mxu0 %v2578_v10  ;;  %1961 = vmatpush3.bf16.msra.mxu1 %v2651_v14 }
  0x4d   :  { %1994 = vmatprep.subr.bf16.mxu1 %v2520_v0 }
  0x4f   :  { %1969 = vmatpush1.bf16.msra.mxu0 %v2582_v15  ;;  %1659 = vmatmul.mubr.f32.vlgmr.msra.gmra.mrb[0].mxu1 %v2521_v1 }
  0x50   :  { %1971 = vmatprep.subr.bf16.mxu0 %v2585_v16  ;;  %1996 = vmatpush3.bf16.msra.mxu1 %v2593_v29 }
  0x51   :  { %1997 = vmatprep.subr.bf16.mxu1 %v2520_v0  ;;  %1693 = vmatprep.mubr.msk.f32.mxu1 %vm2522_vm0, %v2521_v1 }
  0x53   :  { %1973 = vmatpush1.bf16.msra.mxu0 %v2588_v21 }
  0x54   :  { %1975 = vmatprep.subr.bf16.mxu0 %v2591_v23  ;;  %1999 = vmatpush3.bf16.msra.mxu1 %v2599_v34 }
  0x55   :  { %2000 = vmatprep.subr.bf16.mxu1 %v2520_v0 }
  0x57   :  { %1977 = vmatpush1.bf16.msra.mxu0 %v2596_v32 }
  0x58   :  { %1979 = vmatprep.subr.bf16.mxu0 %v2602_v35  ;;  %2002 = vmatpush3.bf16.msra.mxu1 %v2609_v43 }
  0x59   :  { %2003 = vmatprep.subr.bf16.mxu1 %v2520_v0 }
  0x5b   :  { %1981 = vmatpush1.bf16.msra.mxu0 %v2606_v41 }
  0x5c   :  { %1983 = vmatprep.subr.bf16.mxu0 %v2612_v44  ;;  %2005 = vmatpush3.bf16.msra.mxu1 %v2619_v52 }
  0x5d   :  { %2006 = vmatprep.subr.bf16.mxu1 %v2520_v0 }
  0x5f   :  { %1985 = vmatpush1.bf16.msra.mxu0 %v2616_v50 }
  0x60   :  { %1987 = vmatprep.subr.bf16.mxu0 %v2622_v53  ;;  %2008 = vmatpush3.bf16.msra.mxu1 %v2629_v61 }
  0x61   :  { %2009 = vmatprep.subr.bf16.mxu1 %v2520_v0 }
  0x63   :  { %1989 = vmatpush1.bf16.msra.mxu0 %v2626_v59 }
  0x64   :  { %1991 = vmatprep.subr.bf16.mxu0 %v2632_v62  ;;  %2011 = vmatpush3.bf16.msra.mxu1 %v2639_v6 }
  0x65   :  { %2012 = vmatprep.subr.bf16.mxu1 %v2520_v0 }
  0x67   :  { %1993 = vmatpush1.bf16.msra.mxu0 %v2636_v4 }
  0x68   :  { %2019 = vmatprep.subr.bf16.mxu0 %v2574_v5  ;;  %2014 = vmatpush3.bf16.msra.mxu1 %v2645_v11 }
  0x69   :  { %2015 = vmatprep.subr.bf16.mxu1 %v2520_v0 }
  0x6c   :  { %2017 = vmatpush3.bf16.msra.mxu1 %v2651_v14 }
  0x6d   :  { %2050 = vmatprep.subr.bf16.mxu1 %v2520_v0 }
 0x11d   :  { %v167_v18 = vpop.f32.mrb[0].mxu0 }
 0x11e   :  { %v242_v19 = vadd.f32 %v167_v18, %v98_v17  ;;  %v169_v22 = vpop.f32.mrb[1].mxu0 }
 0x11f   :  { %v249_v25 = vadd.f32 %v169_v22, %v99_v20  ;;  %v274_v22 = vld [vmem:[#allocation3 + $0x28] sm:$0xff] }
 0x120   :  { %v1473_v24 = vmul.f32 -1.442695, %v242_v19 }
 0x121   :  { %v1474_v26 = vmul.f32 -1.442695, %v249_v25 }
 0x122   :  { %2364 = vpow2.f32 %v1473_v24  ;;  %v238_v27 = vpop.f32.mrb[0].mxu1 }
 0x123   :  { %v1660_v28 = vpop.f32.mrb[1].mxu1  ;;  %2366 = vpow2.f32 %v1474_v26  ;;  %v262_v38 = vadd.f32 %v2695_v36, %v238_v27 }
 0x12c   :  { %v2365_v30 = vpop.eup %2364 }
 0x12d   :  { %v246_v31 = vadd.f32 1.0, %v2365_v30  ;;  %v2367_v33 = vpop.eup %2366 }
 0x12e   :  { %v253_v37 = vadd.f32 1.0, %v2367_v33 }
 0x12f   :  { %2368 = vrcp.f32 %v246_v31 }
 0x130   :  { %2370 = vrcp.f32 %v253_v37  ;;  %v441_v37 = vld [vmem:[#allocation3 + $0x30] sm:$0xff] }
 0x139   :  { %v2369_v39 = vpop.eup %2368 }
 0x13a   :  { %v263_v42 = vmul.f32 %v2369_v39, %v262_v38  ;;  %v2371_v46 = vpop.eup %2370 }
 0x13b   :  { %v266_v47 = vsub.f32 1.0, %v2371_v46  ;;  %v268_v51 = vmul.f32 0.0, %v2371_v46 }
 0x13c   :  { %v264_v45 = vadd.f32 %v263_v42, %v100_v40  ;;  %v442_v42 = vld [vmem:[#allocation3 + $0x38] sm:$0xff] }
 0x13e   :  { %2372 = vtanh.f32 %v264_v45 }
 0x148   :  { %v2373_v48 = vpop.eup %2372 }
 0x149   :  { %v267_v49 = vmul.f32 %v2373_v48, %v266_v47 }
 0x14b   :  { %v2698_v54 = vadd.f32 %v268_v51, %v267_v49 }
 0x14d   :  { %270 = vst [vmem:[#allocation8] sm:$0xff] %v2698_v54  ;;  %340 = vmatmul.mubr.f32.vlgmr.msra.gmra.mrb[2].mxu0 %v2698_v54  ;;  %1694 = vmatmul.mubr.f32.vlgmr.msra.gmra.mrb[2].mxu1 %v2698_v54 }
 0x14e   :  { %2021 = vmatpush1.bf16.msra.mxu0 %v2576_v9  ;;  %2052 = vmatpush3.bf16.msra.mxu1 %v2593_v29 }
 0x14f   :  { %2023 = vmatprep.subr.bf16.mxu0 %v2578_v10  ;;  %2053 = vmatprep.subr.bf16.mxu1 %v2520_v0 }
 0x150   :  { %508 = vmatprep.mubr.f32.mxu0 %v2521_v1  ;;  %1728 = vmatprep.mubr.msk.f32.mxu1 %vm2522_vm0, %v2521_v1 }
 0x152   :  { %2025 = vmatpush1.bf16.msra.mxu0 %v2582_v15  ;;  %2055 = vmatpush3.bf16.msra.mxu1 %v2599_v34 }
 0x153   :  { %2027 = vmatprep.subr.bf16.mxu0 %v2585_v16  ;;  %2056 = vmatprep.subr.bf16.mxu1 %v2520_v0 }
 0x156   :  { %2029 = vmatpush1.bf16.msra.mxu0 %v2588_v21  ;;  %2058 = vmatpush3.bf16.msra.mxu1 %v2609_v43 }
 0x157   :  { %2031 = vmatprep.subr.bf16.mxu0 %v2591_v23  ;;  %2059 = vmatprep.subr.bf16.mxu1 %v2520_v0 }
 0x15a   :  { %2033 = vmatpush1.bf16.msra.mxu0 %v2596_v32  ;;  %2061 = vmatpush3.bf16.msra.mxu1 %v2619_v52 }
 0x15b   :  { %2035 = vmatprep.subr.bf16.mxu0 %v2602_v35  ;;  %2062 = vmatprep.subr.bf16.mxu1 %v2520_v0 }
 0x15e   :  { %2037 = vmatpush1.bf16.msra.mxu0 %v2606_v41  ;;  %2064 = vmatpush3.bf16.msra.mxu1 %v2629_v61 }
 0x15f   :  { %2039 = vmatprep.subr.bf16.mxu0 %v2612_v44  ;;  %2065 = vmatprep.subr.bf16.mxu1 %v2520_v0 }
 0x162   :  { %2041 = vmatpush1.bf16.msra.mxu0 %v2616_v50  ;;  %2067 = vmatpush3.bf16.msra.mxu1 %v2639_v6 }
 0x163   :  { %2043 = vmatprep.subr.bf16.mxu0 %v2622_v53  ;;  %2068 = vmatprep.subr.bf16.mxu1 %v2520_v0 }
 0x166   :  { %2045 = vmatpush1.bf16.msra.mxu0 %v2626_v59  ;;  %2070 = vmatpush3.bf16.msra.mxu1 %v2645_v11 }
 0x167   :  { %2047 = vmatprep.subr.bf16.mxu0 %v2632_v62  ;;  %2071 = vmatprep.subr.bf16.mxu1 %v2520_v0 }
 0x16a   :  { %2049 = vmatpush1.bf16.msra.mxu0 %v2636_v4  ;;  %2073 = vmatpush3.bf16.msra.mxu1 %v2651_v14 }
 0x16b   :  { %2075 = vmatprep.subr.bf16.mxu0 %v2574_v5  ;;  %2106 = vmatprep.subr.bf16.mxu1 %v2520_v0 }
 0x220   :  { %v341_v56 = vpop.f32.mrb[2].mxu0  ;;  %v412_v57 = vpop.f32.mrb[2].mxu1 }
 0x221   :  { %v416_v58 = vadd.f32 %v341_v56, %v272_v55  ;;  %v343_v63 = vpop.f32.mrb[3].mxu0  ;;  %v1695_v2 = vpop.f32.mrb[3].mxu1  ;;  %v430_v19 = vadd.f32 %v2695_v36, %v412_v57 }
 0x222   :  { %v423_v7 = vadd.f32 %v343_v63, %v273_v60  ;;  %v443_v60 = vld [vmem:[#allocation3 + $0x40] sm:$0xff] }
 0x223   :  { %v1476_v3 = vmul.f32 -1.442695, %v416_v58 }
 0x224   :  { %v1477_v8 = vmul.f32 -1.442695, %v423_v7 }
 0x225   :  { %2374 = vpow2.f32 %v1476_v3 }
 0x226   :  { %2376 = vpow2.f32 %v1477_v8 }
 0x22f   :  { %v2375_v12 = vpop.eup %2374 }
 0x230   :  { %v420_v13 = vadd.f32 1.0, %v2375_v12  ;;  %v2377_v17 = vpop.eup %2376 }
 0x231   :  { %v427_v18 = vadd.f32 1.0, %v2377_v17 }
 0x232   :  { %2378 = vrcp.f32 %v420_v13 }
 0x233   :  { %2380 = vrcp.f32 %v427_v18  ;;  %v610_v18 = vld [vmem:[#allocation3 + $0x48] sm:$0xff] }
 0x23c   :  { %v2379_v20 = vpop.eup %2378 }
 0x23d   :  { %v431_v24 = vmul.f32 %v2379_v20, %v430_v19  ;;  %v2381_v26 = vpop.eup %2380 }
 0x23e   :  { %v434_v27 = vsub.f32 1.0, %v2381_v26  ;;  %v436_v31 = vmul.f32 %v2381_v26, %v2698_v54 }
 0x23f   :  { %v432_v25 = vadd.f32 %v431_v24, %v274_v22  ;;  %v611_v24 = vld [vmem:[#allocation3 + $0x50] sm:$0xff] }
 0x241   :  { %2382 = vtanh.f32 %v432_v25 }
 0x24b   :  { %v2383_v28 = vpop.eup %2382 }
 0x24c   :  { %v435_v30 = vmul.f32 %v2383_v28, %v434_v27 }
 0x24e   :  { %v2740_v33 = vadd.f32 %v436_v31, %v435_v30 }
 0x250   :  { %439 = vst [vmem:[#allocation8 + $0x8] sm:$0xff] %v2740_v33  ;;  %509 = vmatmul.mubr.f32.vlgmr.msra.gmra.mrb[4].mxu0 %v2740_v33  ;;  %1729 = vmatmul.mubr.f32.vlgmr.msra.gmra.mrb[4].mxu1 %v2740_v33 }
 0x251   :  { %2077 = vmatpush1.bf16.msra.mxu0 %v2576_v9  ;;  %2108 = vmatpush3.bf16.msra.mxu1 %v2593_v29 }
 0x252   :  { %2079 = vmatprep.subr.bf16.mxu0 %v2578_v10  ;;  %2109 = vmatprep.subr.bf16.mxu1 %v2520_v0 }
 0x253   :  { %677 = vmatprep.mubr.f32.mxu0 %v2521_v1  ;;  %1763 = vmatprep.mubr.msk.f32.mxu1 %vm2522_vm0, %v2521_v1 }
 0x255   :  { %2081 = vmatpush1.bf16.msra.mxu0 %v2582_v15  ;;  %2111 = vmatpush3.bf16.msra.mxu1 %v2599_v34 }
 0x256   :  { %2083 = vmatprep.subr.bf16.mxu0 %v2585_v16  ;;  %2112 = vmatprep.subr.bf16.mxu1 %v2520_v0 }
 0x259   :  { %2085 = vmatpush1.bf16.msra.mxu0 %v2588_v21  ;;  %2114 = vmatpush3.bf16.msra.mxu1 %v2609_v43 }
 0x25a   :  { %2087 = vmatprep.subr.bf16.mxu0 %v2591_v23  ;;  %2115 = vmatprep.subr.bf16.mxu1 %v2520_v0 }
 0x25d   :  { %2089 = vmatpush1.bf16.msra.mxu0 %v2596_v32  ;;  %2117 = vmatpush3.bf16.msra.mxu1 %v2619_v52 }
 0x25e   :  { %2091 = vmatprep.subr.bf16.mxu0 %v2602_v35  ;;  %2118 = vmatprep.subr.bf16.mxu1 %v2520_v0 }
 0x261   :  { %2093 = vmatpush1.bf16.msra.mxu0 %v2606_v41  ;;  %2120 = vmatpush3.bf16.msra.mxu1 %v2629_v61 }
 0x262   :  { %2095 = vmatprep.subr.bf16.mxu0 %v2612_v44  ;;  %2121 = vmatprep.subr.bf16.mxu1 %v2520_v0 }
 0x265   :  { %2097 = vmatpush1.bf16.msra.mxu0 %v2616_v50  ;;  %2123 = vmatpush3.bf16.msra.mxu1 %v2639_v6 }
 0x266   :  { %2099 = vmatprep.subr.bf16.mxu0 %v2622_v53  ;;  %2124 = vmatprep.subr.bf16.mxu1 %v2520_v0 }
 0x269   :  { %2101 = vmatpush1.bf16.msra.mxu0 %v2626_v59  ;;  %2126 = vmatpush3.bf16.msra.mxu1 %v2645_v11 }
 0x26a   :  { %2103 = vmatprep.subr.bf16.mxu0 %v2632_v62  ;;  %2127 = vmatprep.subr.bf16.mxu1 %v2520_v0 }
 0x26d   :  { %2105 = vmatpush1.bf16.msra.mxu0 %v2636_v4  ;;  %2129 = vmatpush3.bf16.msra.mxu1 %v2651_v14 }
 0x26e   :  { %2131 = vmatprep.subr.bf16.mxu0 %v2574_v5  ;;  %2162 = vmatprep.subr.bf16.mxu1 %v2520_v0 }
 0x323   :  { %v510_v38 = vpop.f32.mrb[4].mxu0  ;;  %v581_v39 = vpop.f32.mrb[4].mxu1 }
 0x324   :  { %v585_v40 = vadd.f32 %v510_v38, %v441_v37  ;;  %v512_v45 = vpop.f32.mrb[5].mxu0  ;;  %v1730_v46 = vpop.f32.mrb[5].mxu1  ;;  %v599_v57 = vadd.f32 %v2695_v36, %v581_v39 }
 0x325   :  { %v592_v48 = vadd.f32 %v512_v45, %v442_v42  ;;  %v612_v42 = vld [vmem:[#allocation3 + $0x58] sm:$0xff] }
 0x326   :  { %v1478_v47 = vmul.f32 -1.442695, %v585_v40 }
 0x327   :  { %v1479_v49 = vmul.f32 -1.442695, %v592_v48 }
 0x328   :  { %2384 = vpow2.f32 %v1478_v47 }
 0x329   :  { %2386 = vpow2.f32 %v1479_v49 }
 0x332   :  { %v2385_v51 = vpop.eup %2384 }
 0x333   :  { %v589_v54 = vadd.f32 1.0, %v2385_v51  ;;  %v2387_v55 = vpop.eup %2386 }
 0x334   :  { %v596_v56 = vadd.f32 1.0, %v2387_v55 }
 0x335   :  { %2388 = vrcp.f32 %v589_v54 }
 0x336   :  { %2390 = vrcp.f32 %v596_v56  ;;  %v779_v56 = vld [vmem:[#allocation3 + $0x60] sm:$0xff] }
 0x33f   :  { %v2389_v58 = vpop.eup %2388 }
 0x340   :  { %v600_v63 = vmul.f32 %v2389_v58, %v599_v57  ;;  %v2391_v3 = vpop.eup %2390 }
 0x341   :  { %v603_v7 = vsub.f32 1.0, %v2391_v3  ;;  %v605_v13 = vmul.f32 %v2391_v3, %v2740_v33 }
 0x342   :  { %v601_v2 = vadd.f32 %v600_v63, %v443_v60  ;;  %v780_v63 = vld [vmem:[#allocation3 + $0x68] sm:$0xff] }
 0x344   :  { %2392 = vtanh.f32 %v601_v2 }
 0x34e   :  { %v2393_v8 = vpop.eup %2392 }
 0x34f   :  { %v604_v12 = vmul.f32 %v2393_v8, %v603_v7 }
 0x351   :  { %v2782_v17 = vadd.f32 %v605_v13, %v604_v12 }
 0x353   :  { %608 = vst [vmem:[#allocation8 + $0x10] sm:$0xff] %v2782_v17  ;;  %678 = vmatmul.mubr.f32.vlgmr.msra.gmra.mrb[6].mxu0 %v2782_v17  ;;  %1764 = vmatmul.mubr.f32.vlgmr.msra.gmra.mrb[6].mxu1 %v2782_v17 }
 0x354   :  { %2133 = vmatpush1.bf16.msra.mxu0 %v2576_v9  ;;  %2164 = vmatpush3.bf16.msra.mxu1 %v2593_v29 }
 0x355   :  { %2135 = vmatprep.subr.bf16.mxu0 %v2578_v10  ;;  %2165 = vmatprep.subr.bf16.mxu1 %v2520_v0 }
 0x356   :  { %846 = vmatprep.mubr.f32.mxu0 %v2521_v1  ;;  %1798 = vmatprep.mubr.msk.f32.mxu1 %vm2522_vm0, %v2521_v1 }
 0x358   :  { %2137 = vmatpush1.bf16.msra.mxu0 %v2582_v15  ;;  %2167 = vmatpush3.bf16.msra.mxu1 %v2599_v34 }
 0x359   :  { %2139 = vmatprep.subr.bf16.mxu0 %v2585_v16  ;;  %2168 = vmatprep.subr.bf16.mxu1 %v2520_v0 }
 0x35c   :  { %2141 = vmatpush1.bf16.msra.mxu0 %v2588_v21  ;;  %2170 = vmatpush3.bf16.msra.mxu1 %v2609_v43 }
 0x35d   :  { %2143 = vmatprep.subr.bf16.mxu0 %v2591_v23  ;;  %2171 = vmatprep.subr.bf16.mxu1 %v2520_v0 }
 0x360   :  { %2145 = vmatpush1.bf16.msra.mxu0 %v2596_v32  ;;  %2173 = vmatpush3.bf16.msra.mxu1 %v2619_v52 }
 0x361   :  { %2147 = vmatprep.subr.bf16.mxu0 %v2602_v35  ;;  %2174 = vmatprep.subr.bf16.mxu1 %v2520_v0 }
 0x364   :  { %2149 = vmatpush1.bf16.msra.mxu0 %v2606_v41  ;;  %2176 = vmatpush3.bf16.msra.mxu1 %v2629_v61 }
 0x365   :  { %2151 = vmatprep.subr.bf16.mxu0 %v2612_v44  ;;  %2177 = vmatprep.subr.bf16.mxu1 %v2520_v0 }
 0x368   :  { %2153 = vmatpush1.bf16.msra.mxu0 %v2616_v50  ;;  %2179 = vmatpush3.bf16.msra.mxu1 %v2639_v6 }
 0x369   :  { %2155 = vmatprep.subr.bf16.mxu0 %v2622_v53  ;;  %2180 = vmatprep.subr.bf16.mxu1 %v2520_v0 }
 0x36c   :  { %2157 = vmatpush1.bf16.msra.mxu0 %v2626_v59  ;;  %2182 = vmatpush3.bf16.msra.mxu1 %v2645_v11 }
 0x36d   :  { %2159 = vmatprep.subr.bf16.mxu0 %v2632_v62  ;;  %2183 = vmatprep.subr.bf16.mxu1 %v2520_v0 }
 0x370   :  { %2161 = vmatpush1.bf16.msra.mxu0 %v2636_v4  ;;  %2185 = vmatpush3.bf16.msra.mxu1 %v2651_v14 }
 0x371   :  { %2187 = vmatprep.subr.bf16.mxu0 %v2574_v5  ;;  %2218 = vmatprep.subr.bf16.mxu1 %v2520_v0 }
 0x426   :  { %v679_v19 = vpop.f32.mrb[6].mxu0  ;;  %v750_v20 = vpop.f32.mrb[6].mxu1 }
 0x427   :  { %v754_v22 = vadd.f32 %v679_v19, %v610_v18  ;;  %v681_v25 = vpop.f32.mrb[7].mxu0  ;;  %v1765_v26 = vpop.f32.mrb[7].mxu1  ;;  %v768_v39 = vadd.f32 %v2695_v36, %v750_v20 }
 0x428   :  { %v761_v28 = vadd.f32 %v681_v25, %v611_v24  ;;  %v781_v24 = vld [vmem:[#allocation3 + $0x70] sm:$0xff] }
 0x429   :  { %v1480_v27 = vmul.f32 -1.442695, %v754_v22 }
 0x42a   :  { %v1481_v30 = vmul.f32 -1.442695, %v761_v28 }
 0x42b   :  { %2394 = vpow2.f32 %v1480_v27 }
 0x42c   :  { %2396 = vpow2.f32 %v1481_v30 }
 0x435   :  { %v2395_v31 = vpop.eup %2394 }
 0x436   :  { %v758_v33 = vadd.f32 1.0, %v2395_v31  ;;  %v2397_v37 = vpop.eup %2396 }
 0x437   :  { %v765_v38 = vadd.f32 1.0, %v2397_v37 }
 0x438   :  { %2398 = vrcp.f32 %v758_v33 }
 0x439   :  { %2400 = vrcp.f32 %v765_v38  ;;  %v948_v38 = vld [vmem:[#allocation3 + $0x78] sm:$0xff] }
 0x442   :  { %v2399_v40 = vpop.eup %2398 }
 0x443   :  { %v769_v45 = vmul.f32 %v2399_v40, %v768_v39  ;;  %v2401_v47 = vpop.eup %2400 }
 0x444   :  { %v772_v48 = vsub.f32 1.0, %v2401_v47  ;;  %v774_v54 = vmul.f32 %v2401_v47, %v2782_v17 }
 0x445   :  { %v770_v46 = vadd.f32 %v769_v45, %v612_v42  ;;  %v949_v45 = vld [vmem:[#allocation3 + $0x80] sm:$0xff] }
 0x447   :  { %2402 = vtanh.f32 %v770_v46 }
 0x451   :  { %v2403_v49 = vpop.eup %2402 }
 0x452   :  { %v773_v51 = vmul.f32 %v2403_v49, %v772_v48 }
 0x454   :  { %v2824_v55 = vadd.f32 %v774_v54, %v773_v51 }
 0x456   :  { %777 = vst [vmem:[#allocation8 + $0x18] sm:$0xff] %v2824_v55  ;;  %847 = vmatmul.mubr.f32.vlgmr.msra.gmra.mrb[8].mxu0 %v2824_v55  ;;  %1799 = vmatmul.mubr.f32.vlgmr.msra.gmra.mrb[8].mxu1 %v2824_v55 }
 0x457   :  { %2189 = vmatpush1.bf16.msra.mxu0 %v2576_v9  ;;  %2220 = vmatpush3.bf16.msra.mxu1 %v2593_v29 }
 0x458   :  { %2191 = vmatprep.subr.bf16.mxu0 %v2578_v10  ;;  %2221 = vmatprep.subr.bf16.mxu1 %v2520_v0 }
 0x459   :  { %1015 = vmatprep.mubr.f32.mxu0 %v2521_v1  ;;  %1833 = vmatprep.mubr.msk.f32.mxu1 %vm2522_vm0, %v2521_v1 }
 0x45b   :  { %2193 = vmatpush1.bf16.msra.mxu0 %v2582_v15  ;;  %2223 = vmatpush3.bf16.msra.mxu1 %v2599_v34 }
 0x45c   :  { %2195 = vmatprep.subr.bf16.mxu0 %v2585_v16  ;;  %2224 = vmatprep.subr.bf16.mxu1 %v2520_v0 }
 0x45f   :  { %2197 = vmatpush1.bf16.msra.mxu0 %v2588_v21  ;;  %2226 = vmatpush3.bf16.msra.mxu1 %v2609_v43 }
 0x460   :  { %2199 = vmatprep.subr.bf16.mxu0 %v2591_v23  ;;  %2227 = vmatprep.subr.bf16.mxu1 %v2520_v0 }
 0x463   :  { %2201 = vmatpush1.bf16.msra.mxu0 %v2596_v32  ;;  %2229 = vmatpush3.bf16.msra.mxu1 %v2619_v52 }
 0x464   :  { %2203 = vmatprep.subr.bf16.mxu0 %v2602_v35  ;;  %2230 = vmatprep.subr.bf16.mxu1 %v2520_v0 }
 0x467   :  { %2205 = vmatpush1.bf16.msra.mxu0 %v2606_v41  ;;  %2232 = vmatpush3.bf16.msra.mxu1 %v2629_v61 }
 0x468   :  { %2207 = vmatprep.subr.bf16.mxu0 %v2612_v44  ;;  %2233 = vmatprep.subr.bf16.mxu1 %v2520_v0 }
 0x46b   :  { %2209 = vmatpush1.bf16.msra.mxu0 %v2616_v50  ;;  %2235 = vmatpush3.bf16.msra.mxu1 %v2639_v6 }
 0x46c   :  { %2211 = vmatprep.subr.bf16.mxu0 %v2622_v53  ;;  %2236 = vmatprep.subr.bf16.mxu1 %v2520_v0 }
 0x46f   :  { %2213 = vmatpush1.bf16.msra.mxu0 %v2626_v59  ;;  %2238 = vmatpush3.bf16.msra.mxu1 %v2645_v11 }
 0x470   :  { %2215 = vmatprep.subr.bf16.mxu0 %v2632_v62  ;;  %2239 = vmatprep.subr.bf16.mxu1 %v2520_v0 }
 0x473   :  { %2217 = vmatpush1.bf16.msra.mxu0 %v2636_v4  ;;  %2241 = vmatpush3.bf16.msra.mxu1 %v2651_v14 }
 0x474   :  { %2243 = vmatprep.subr.bf16.mxu0 %v2574_v5  ;;  %2274 = vmatprep.subr.bf16.mxu1 %v2520_v0 }
 0x529   :  { %v848_v57 = vpop.f32.mrb[8].mxu0  ;;  %v919_v58 = vpop.f32.mrb[8].mxu1 }
 0x52a   :  { %v923_v60 = vadd.f32 %v848_v57, %v779_v56  ;;  %v850_v2 = vpop.f32.mrb[9].mxu0  ;;  %v1800_v3 = vpop.f32.mrb[9].mxu1  ;;  %v937_v20 = vadd.f32 %v2695_v36, %v919_v58 }
 0x52b   :  { %v930_v8 = vadd.f32 %v850_v2, %v780_v63 }
 0x52c   :  { %v1482_v7 = vmul.f32 -1.442695, %v923_v60  ;;  %v950_v60 = vld [vmem:[#allocation3 + $0x88] sm:$0xff] }
 0x52d   :  { %v1483_v12 = vmul.f32 -1.442695, %v930_v8 }
 0x52e   :  { %2404 = vpow2.f32 %v1482_v7 }
 0x52f   :  { %2406 = vpow2.f32 %v1483_v12 }
 0x538   :  { %v2405_v13 = vpop.eup %2404 }
 0x539   :  { %v927_v17 = vadd.f32 1.0, %v2405_v13  ;;  %v2407_v18 = vpop.eup %2406 }
 0x53a   :  { %v934_v19 = vadd.f32 1.0, %v2407_v18  ;;  %v1286_v18 = vld [vmem:[#allocation3 + $0xa8] sm:$0xff] }
 0x53b   :  { %2408 = vrcp.f32 %v927_v17 }
 0x53c   :  { %2410 = vrcp.f32 %v934_v19 }
 0x545   :  { %v2409_v22 = vpop.eup %2408 }
 0x546   :  { %v938_v25 = vmul.f32 %v2409_v22, %v937_v20  ;;  %v2411_v27 = vpop.eup %2410 }
 0x547   :  { %v941_v28 = vsub.f32 1.0, %v2411_v27  ;;  %v943_v33 = vmul.f32 %v2411_v27, %v2824_v55 }
 0x548   :  { %v939_v26 = vadd.f32 %v938_v25, %v781_v24  ;;  %v1287_v24 = vld [vmem:[#allocation3 + $0xb0] sm:$0xff] }
 0x54a   :  { %2412 = vtanh.f32 %v939_v26 }
 0x554   :  { %v2413_v30 = vpop.eup %2412 }
 0x555   :  { %v942_v31 = vmul.f32 %v2413_v30, %v941_v28 }
 0x557   :  { %v2866_v37 = vadd.f32 %v943_v33, %v942_v31 }
 0x559   :  { %946 = vst [vmem:[#allocation8 + $0x20] sm:$0xff] %v2866_v37  ;;  %1016 = vmatmul.mubr.f32.vlgmr.msra.gmra.mrb[10].mxu0 %v2866_v37  ;;  %1834 = vmatmul.mubr.f32.vlgmr.msra.gmra.mrb[10].mxu1 %v2866_v37 }
 0x55a   :  { %2245 = vmatpush1.bf16.msra.mxu0 %v2576_v9  ;;  %2276 = vmatpush3.bf16.msra.mxu1 %v2593_v29 }
 0x55b   :  { %2247 = vmatprep.subr.bf16.mxu0 %v2578_v10  ;;  %2277 = vmatprep.subr.bf16.mxu1 %v2520_v0 }
 0x55c   :  { %1184 = vmatprep.mubr.f32.mxu0 %v2521_v1  ;;  %1868 = vmatprep.mubr.msk.f32.mxu1 %vm2522_vm0, %v2521_v1 }
 0x55e   :  { %2249 = vmatpush1.bf16.msra.mxu0 %v2582_v15  ;;  %2279 = vmatpush3.bf16.msra.mxu1 %v2599_v34 }
 0x55f   :  { %2251 = vmatprep.subr.bf16.mxu0 %v2585_v16  ;;  %2280 = vmatprep.subr.bf16.mxu1 %v2520_v0 }
 0x562   :  { %2253 = vmatpush1.bf16.msra.mxu0 %v2588_v21  ;;  %2282 = vmatpush3.bf16.msra.mxu1 %v2609_v43 }
 0x563   :  { %2255 = vmatprep.subr.bf16.mxu0 %v2591_v23  ;;  %2283 = vmatprep.subr.bf16.mxu1 %v2520_v0 }
 0x566   :  { %2257 = vmatpush1.bf16.msra.mxu0 %v2596_v32  ;;  %2285 = vmatpush3.bf16.msra.mxu1 %v2619_v52 }
 0x567   :  { %2259 = vmatprep.subr.bf16.mxu0 %v2602_v35  ;;  %2286 = vmatprep.subr.bf16.mxu1 %v2520_v0 }
 0x56a   :  { %2261 = vmatpush1.bf16.msra.mxu0 %v2606_v41  ;;  %2288 = vmatpush3.bf16.msra.mxu1 %v2629_v61 }
 0x56b   :  { %2263 = vmatprep.subr.bf16.mxu0 %v2612_v44  ;;  %2289 = vmatprep.subr.bf16.mxu1 %v2520_v0 }
 0x56e   :  { %2265 = vmatpush1.bf16.msra.mxu0 %v2616_v50  ;;  %2291 = vmatpush3.bf16.msra.mxu1 %v2639_v6 }
 0x56f   :  { %2267 = vmatprep.subr.bf16.mxu0 %v2622_v53  ;;  %2292 = vmatprep.subr.bf16.mxu1 %v2520_v0 }
 0x572   :  { %2269 = vmatpush1.bf16.msra.mxu0 %v2626_v59  ;;  %2294 = vmatpush3.bf16.msra.mxu1 %v2645_v11 }
 0x573   :  { %2271 = vmatprep.subr.bf16.mxu0 %v2632_v62  ;;  %2295 = vmatprep.subr.bf16.mxu1 %v2520_v0 }
 0x576   :  { %2273 = vmatpush1.bf16.msra.mxu0 %v2636_v4  ;;  %2297 = vmatpush3.bf16.msra.mxu1 %v2651_v14 }
 0x577   :  { %2299 = vmatprep.subr.bf16.mxu0 %v2574_v5  ;;  %2330 = vmatprep.subr.bf16.mxu1 %v2520_v0 }
 0x62c   :  { %v1017_v39 = vpop.f32.mrb[10].mxu0  ;;  %v1088_v40 = vpop.f32.mrb[10].mxu1 }
 0x62d   :  { %v1092_v42 = vadd.f32 %v1017_v39, %v948_v38  ;;  %v1019_v46 = vpop.f32.mrb[11].mxu0  ;;  %v1835_v47 = vpop.f32.mrb[11].mxu1  ;;  %v1106_v5 = vadd.f32 %v2695_v36, %v1088_v40 }
 0x62e   :  { %v1099_v49 = vadd.f32 %v1019_v46, %v949_v45 }
 0x62f   :  { %v1484_v48 = vmul.f32 -1.442695, %v1092_v42  ;;  %v1288_v42 = vld [vmem:[#allocation3 + $0xb8] sm:$0xff] }
 0x630   :  { %v1485_v51 = vmul.f32 -1.442695, %v1099_v49 }
 0x631   :  { %2414 = vpow2.f32 %v1484_v48 }
 0x632   :  { %2416 = vpow2.f32 %v1485_v51 }
 0x63b   :  { %v2415_v54 = vpop.eup %2414 }
 0x63c   :  { %v1096_v55 = vadd.f32 1.0, %v2415_v54  ;;  %v2417_v56 = vpop.eup %2416 }
 0x63d   :  { %v1103_v57 = vadd.f32 1.0, %v2417_v56 }
 0x63e   :  { %2418 = vrcp.f32 %v1096_v55 }
 0x63f   :  { %2420 = vrcp.f32 %v1103_v57 }
 0x648   :  { %v2419_v58 = vpop.eup %2418 }
 0x649   :  { %v1107_v63 = vmul.f32 %v2419_v58, %v1106_v5  ;;  %v2421_v3 = vpop.eup %2420 }
 0x64a   :  { %v1110_v7 = vsub.f32 1.0, %v2421_v3  ;;  %v1112_v13 = vmul.f32 %v2421_v3, %v2866_v37 }
 0x64b   :  { %v1108_v2 = vadd.f32 %v1107_v63, %v950_v60 }
 0x64d   :  { %2422 = vtanh.f32 %v1108_v2 }
 0x657   :  { %v2423_v8 = vpop.eup %2422 }
 0x658   :  { %v1111_v12 = vmul.f32 %v2423_v8, %v1110_v7 }
 0x65a   :  { %v2908_v17 = vadd.f32 %v1112_v13, %v1111_v12 }
 0x65c   :  { %1115 = vst [vmem:[#allocation8 + $0x28] sm:$0xff] %v2908_v17  ;;  %1185 = vmatmul.mubr.f32.vlgmr.msra.gmra.mrb[12].mxu0 %v2908_v17  ;;  %1869 = vmatmul.mubr.f32.vlgmr.msra.gmra.mrb[12].mxu1 %v2908_v17 }
 0x65d   :  { %2301 = vmatpush1.bf16.msra.mxu0 %v2576_v9  ;;  %2332 = vmatpush3.bf16.msra.mxu1 %v2593_v29 }
 0x65e   :  { %2303 = vmatprep.subr.bf16.mxu0 %v2578_v10  ;;  %2333 = vmatprep.subr.bf16.mxu1 %v2520_v0 }
 0x65f   :  { %1353 = vmatprep.mubr.f32.mxu0 %v2521_v1  ;;  %1903 = vmatprep.mubr.msk.f32.mxu1 %vm2522_vm0, %v2521_v1  ;;  %v1117_v1 = vld [vmem:[#allocation3 + $0x90] sm:$0xff] }
 0x661   :  { %2305 = vmatpush1.bf16.msra.mxu0 %v2582_v15  ;;  %2335 = vmatpush3.bf16.msra.mxu1 %v2599_v34 }
 0x662   :  { %2307 = vmatprep.subr.bf16.mxu0 %v2585_v16  ;;  %2336 = vmatprep.subr.bf16.mxu1 %v2520_v0  ;;  %v1118_v16 = vld [vmem:[#allocation3 + $0x98] sm:$0xff] }
 0x665   :  { %2309 = vmatpush1.bf16.msra.mxu0 %v2588_v21  ;;  %2338 = vmatpush3.bf16.msra.mxu1 %v2609_v43 }
 0x666   :  { %2311 = vmatprep.subr.bf16.mxu0 %v2591_v23  ;;  %2339 = vmatprep.subr.bf16.mxu1 %v2520_v0 }
 0x669   :  { %2313 = vmatpush1.bf16.msra.mxu0 %v2596_v32  ;;  %2341 = vmatpush3.bf16.msra.mxu1 %v2619_v52  ;;  %v1119_v52 = vld [vmem:[#allocation3 + $0xa0] sm:$0xff] }
 0x66a   :  { %2315 = vmatprep.subr.bf16.mxu0 %v2602_v35  ;;  %2342 = vmatprep.subr.bf16.mxu1 %v2520_v0 }
 0x66d   :  { %2317 = vmatpush1.bf16.msra.mxu0 %v2606_v41  ;;  %2344 = vmatpush3.bf16.msra.mxu1 %v2629_v61 }
 0x66e   :  { %2319 = vmatprep.subr.bf16.mxu0 %v2612_v44  ;;  %2345 = vmatprep.subr.bf16.mxu1 %v2520_v0 }
 0x671   :  { %2321 = vmatpush1.bf16.msra.mxu0 %v2616_v50  ;;  %2347 = vmatpush3.bf16.msra.mxu1 %v2639_v6 }
 0x672   :  { %2323 = vmatprep.subr.bf16.mxu0 %v2622_v53  ;;  %2348 = vmatprep.subr.bf16.mxu1 %v2520_v0 }
 0x675   :  { %2325 = vmatpush1.bf16.msra.mxu0 %v2626_v59  ;;  %2350 = vmatpush3.bf16.msra.mxu1 %v2645_v11 }
 0x676   :  { %2327 = vmatprep.subr.bf16.mxu0 %v2632_v62  ;;  %2351 = vmatprep.subr.bf16.mxu1 %v2520_v0 }
 0x679   :  { %2329 = vmatpush1.bf16.msra.mxu0 %v2636_v4  ;;  %2353 = vmatpush3.bf16.msra.mxu1 %v2651_v14 }
 0x72f   :  { %v1186_v9 = vpop.f32.mrb[12].mxu0  ;;  %v1257_v10 = vpop.f32.mrb[12].mxu1 }
 0x730   :  { %v1261_v15 = vadd.f32 %v1186_v9, %v1117_v1  ;;  %v1188_v21 = vpop.f32.mrb[13].mxu0  ;;  %v1870_v23 = vpop.f32.mrb[13].mxu1  ;;  %v1275_v44 = vadd.f32 %v2695_v36, %v1257_v10 }
 0x731   :  { %v1268_v32 = vadd.f32 %v1188_v21, %v1118_v16 }
 0x732   :  { %v1486_v29 = vmul.f32 -1.442695, %v1261_v15 }
 0x733   :  { %v1487_v34 = vmul.f32 -1.442695, %v1268_v32 }
 0x734   :  { %2424 = vpow2.f32 %v1486_v29 }
 0x735   :  { %2426 = vpow2.f32 %v1487_v34 }
 0x73e   :  { %v2425_v35 = vpop.eup %2424 }
 0x73f   :  { %v1265_v41 = vadd.f32 1.0, %v2425_v35  ;;  %v2427_v0 = vpop.eup %2426 }
 0x740   :  { %v1272_v43 = vadd.f32 1.0, %v2427_v0 }
 0x741   :  { %2428 = vrcp.f32 %v1265_v41 }
 0x742   :  { %2430 = vrcp.f32 %v1272_v43 }
 0x74b   :  { %v2429_v50 = vpop.eup %2428 }
 0x74c   :  { %v1276_v53 = vmul.f32 %v2429_v50, %v1275_v44  ;;  %v2431_v61 = vpop.eup %2430 }
 0x74d   :  { %v1279_v62 = vsub.f32 1.0, %v2431_v61  ;;  %v1281_v11 = vmul.f32 %v2431_v61, %v2908_v17 }
 0x74e   :  { %v1277_v59 = vadd.f32 %v1276_v53, %v1119_v52 }
 0x750   :  { %2432 = vtanh.f32 %v1277_v59 }
 0x75a   :  { %v2433_v4 = vpop.eup %2432 }
 0x75b   :  { %v1280_v6 = vmul.f32 %v2433_v4, %v1279_v62 }
 0x75d   :  { %v1282_v14 = vadd.f32 %v1281_v11, %v1280_v6 }
 0x75f   :  { %1284 = vst [vmem:[#allocation8 + $0x30] sm:$0xff] %v1282_v14  ;;  %1354 = vmatmul.mubr.f32.vlgmr.msra.gmra.mrb[14].mxu0 %v1282_v14  ;;  %1904 = vmatmul.mubr.f32.vlgmr.msra.gmra.mrb[14].mxu1 %v1282_v14 }
 0x832   :  { %v1355_v19 = vpop.f32.mrb[14].mxu0  ;;  %v1426_v20 = vpop.f32.mrb[14].mxu1 }
 0x833   :  { %v1430_v22 = vadd.f32 %v1355_v19, %v1286_v18  ;;  %v1357_v25 = vpop.f32.mrb[15].mxu0  ;;  %v1905_v26 = vpop.f32.mrb[15].mxu1  ;;  %v1444_v39 = vadd.f32 %v2695_v36, %v1426_v20 }
 0x834   :  { %v1437_v28 = vadd.f32 %v1357_v25, %v1287_v24 }
 0x835   :  { %v1488_v27 = vmul.f32 -1.442695, %v1430_v22 }
 0x836   :  { %v1489_v30 = vmul.f32 -1.442695, %v1437_v28 }
 0x837   :  { %2434 = vpow2.f32 %v1488_v27 }
 0x838   :  { %2436 = vpow2.f32 %v1489_v30 }
 0x841   :  { %v2435_v31 = vpop.eup %2434 }
 0x842   :  { %v1434_v33 = vadd.f32 1.0, %v2435_v31  ;;  %v2437_v37 = vpop.eup %2436 }
 0x843   :  { %v1441_v38 = vadd.f32 1.0, %v2437_v37 }
 0x844   :  { %2438 = vrcp.f32 %v1434_v33 }
 0x845   :  { %2440 = vrcp.f32 %v1441_v38 }
 0x84e   :  { %v2439_v40 = vpop.eup %2438 }
 0x84f   :  { %v1445_v45 = vmul.f32 %v2439_v40, %v1444_v39  ;;  %v2441_v47 = vpop.eup %2440 }
 0x850   :  { %v1448_v48 = vsub.f32 1.0, %v2441_v47  ;;  %v1450_v54 = vmul.f32 %v2441_v47, %v1282_v14 }
 0x851   :  { %v1446_v46 = vadd.f32 %v1445_v45, %v1288_v42 }
 0x853   :  { %2442 = vtanh.f32 %v1446_v46 }
 0x85d   :  { %v2443_v49 = vpop.eup %2442 }
 0x85e   :  { %v1449_v51 = vmul.f32 %v2443_v49, %v1448_v48 }
 0x860   :  { %v1451_v55 = vadd.f32 %v1450_v54, %v1449_v51 }
 0x862   :  { %1453 = vst [vmem:[#allocation8 + $0x38] sm:$0xff] %v1451_v55 }
 0x863   :  { %2499 = shalt.err (!%p2496_p6)
}
 0x864   :  { %s2500_s15 = scalar_lea.hbm %s2964_s3, 1024 }
 0x865   :  { %p2501_p7 = scmp.ne.s32.totalorder %s2964_s3, %s2500_s15  ;;  %p2504_p8 = scmp.lt.u32.totalorder %s2500_s15, %s2964_s3 }
 0x867   :  { %p2506_p9 = pnand %p2504_p8, %p2501_p7 }
 0x869   :  { %2509 = shalt.err (!%p2506_p9)
}
 0x86a   :  { %s2524_s20 = smov 128   ;;  %s2525_s21 = smov 8  }
 0x86b   :  { %1466 = dma.vmem_to_hbm [thread:$0]  %s1461_s11, 1024, %s2964_s3, [#allocation5], %s2524_s20, %s2524_s20, %s2525_s21  }
 0x86c   :  { %2514 = dma.done.wait [#allocation5], 1024  }
 0x86d   :  { %2515 = vsyncadd [#allocation5], 4294966272 }
 0x86e   :  { %1470 = vsyncpa [#allocation4], 1 }
 0x86f   :  { %1471 = vsyncpa [#allocation7], 1 }
 0x870   :  { %1472 = vsyncpa [#allocation5], 1 }

</bundles_post_ra>
